<compile_context>
chip_gen: v6e
topology: v6e:2x2x1
jax: 0.10.0
libtpu: 0.0.40
codegen_flags: <defaults>
</compile_context>

<pallas_src>
import jax
import jax.numpy as jnp
from jax.experimental import pallas as pl
from jax.experimental.pallas import tpu as pltpu


def _round_up(n, m):
    return ((n + m - 1) // m) * m


# ---------------------------------------------------------------------------
# Fused kernel: in-kernel 3x3 taps -> conv matmuls -> ReLU -> masked-avg pool
#               (on the MXU) -> fused CC|DD head matmul.  One batch element per
#               grid step.
# ---------------------------------------------------------------------------
def _make_smallnet_kernel(row_stride, ksize):
    """Closure over static conv geometry (tap offsets in the flattened padded input)."""
    offsets = tuple(dh * row_stride + dw for dh in range(ksize) for dw in range(ksize))

    def kernel(x_ref, wconv_ref, bconv_ref, pool_ref, wheads_ref, bheads_ref,
               heads_ref, *feats_ref):
        # x_ref      : [P, C]       bf16  zero-padded, channels-last, spatially flattened
        # wconv_ref  : [k*k*C, Fp]  bf16  conv weight, tap-major rows (Fp = roundup(F,128))
        # bconv_ref  : [1, Fp]      f32
        # pool_ref   : [1, P_out]   f32   1/(H*W) at valid rows, 0 at row-wrap junk rows
        # wheads_ref : [Fp, NCDp]   f32   [Wcc | Wdd]
        # bheads_ref : [1, NCDp]    f32
        # heads_ref  : [1, NCDp]    f32   out: [logits | dom_logits] (lane-padded)
        # feats_ref  : ([1, Fp],)   f32   optional out: pooled features (lane-padded)
        c_in = x_ref.shape[1]
        p_out = pool_ref.shape[1]
        fp = wconv_ref.shape[1]

        # Conv as 9 accumulated matmuls: each tap is a statically shifted window of
        # the flattened padded input; contraction over input channels, f32 accumulate.
        acc = jnp.zeros((p_out, fp), jnp.float32)
        for t, off in enumerate(offsets):
            tap = x_ref[pl.ds(off, p_out), :]              # [P_out, C]   (bf16)
            w_t = wconv_ref[pl.ds(t * c_in, c_in), :]      # [C, Fp]      (bf16)
            acc = acc + jnp.dot(tap, w_t, preferred_element_type=jnp.float32)

        y = jnp.maximum(acc + bconv_ref[...], 0.0)         # bias + ReLU  [P_out, Fp] f32

        # Masked global-average pool on the MXU (junk rows carry weight 0).
        feats = jnp.dot(pool_ref[...], y,
                        preferred_element_type=jnp.float32)            # [1, Fp] f32

        # Fused class + domain heads (f32).
        heads_ref[...] = (jnp.dot(feats, wheads_ref[...],
                                  preferred_element_type=jnp.float32)
                          + bheads_ref[...])                           # [1, NCDp]

        if feats_ref:
            feats_ref[0][...] = feats

    return kernel


# ---------------------------------------------------------------------------
# One-time build: pack/pad parameters, build pool vector, return jitted forward.
# ---------------------------------------------------------------------------
def build_smallnet_forward(params, h, w, get_feat=False):
    wconv = jnp.asarray(params["wconv"], jnp.float32)    # [F, C, k, k]  (torch layout)
    bconv = jnp.asarray(params["bconv"], jnp.float32)    # [F]
    wcc = jnp.asarray(params["wcc"], jnp.float32)        # [NC, F]
    bcc = jnp.asarray(params["bcc"], jnp.float32)        # [NC]
    wdd = jnp.asarray(params["wdd"], jnp.float32)        # [ND, F]
    bdd = jnp.asarray(params["bdd"], jnp.float32)        # [ND]

    f_feat, c_in, ksize, _ = wconv.shape
    nc = wcc.shape[0]
    nd = wdd.shape[0]
    fp = _round_up(f_feat, 128)                          # lane-dense feature dim
    ncdp = _round_up(nc + nd, 128)                       # lane-dense fused-head dim

    pad = (ksize - 1) // 2                               # "same" conv (k=3 -> pad=1)
    wp = w + 2 * pad                                     # padded row stride
    p_full = (h + 2 * pad) * wp                          # flattened padded spatial size
    p_out = (h - 1) * wp + w                             # conv rows computed per batch
                                                         # (rows with q % wp >= w = junk)

    # ---- one-time parameter packing (lane-dense, zero padded) ----
    # conv weight -> tap-major [k*k*C, F]: row (kh*k + kw)*C + c  holds W[f, c, kh, kw]
    w_taps = jnp.transpose(wconv, (2, 3, 1, 0)).reshape(ksize * ksize * c_in, f_feat)
    wconv_p = jnp.zeros((ksize * ksize * c_in, fp), jnp.bfloat16)
    wconv_p = wconv_p.at[:, :f_feat].set(w_taps.astype(jnp.bfloat16))
    bconv_p = jnp.zeros((1, fp), jnp.float32).at[0, :f_feat].set(bconv)

    wheads = jnp.concatenate([wcc.T, wdd.T], axis=1)                     # [F, NC+ND]
    wheads_p = jnp.zeros((fp, ncdp), jnp.float32).at[:f_feat, :nc + nd].set(wheads)
    bheads = jnp.concatenate([bcc, bdd], axis=0)
    bheads_p = jnp.zeros((1, ncdp), jnp.float32).at[0, :nc + nd].set(bheads)

    # Masked-average pool vector: 1/(H*W) on valid output rows, 0 on wrap rows.
    q = jnp.arange(p_out, dtype=jnp.int32)
    pool_vec = jnp.where((q % wp) < w, 1.0 / (h * w), 0.0).astype(jnp.float32)[None, :]

    kernel = _make_smallnet_kernel(wp, ksize)

    @jax.jit
    def forward(x):
        b = x.shape[0]
        # NCHW -> zero-padded NHWC, spatially flattened: [B, P, C] (bf16 MXU operand).
        xflat = jnp.pad(jnp.transpose(x, (0, 2, 3, 1)),
                        ((0, 0), (pad, pad), (pad, pad), (0, 0)))
        xflat = xflat.reshape(b, p_full, c_in).astype(jnp.bfloat16)

        out_shape = [jax.ShapeDtypeStruct((b, 1, ncdp), jnp.float32)]
        out_specs = [pl.BlockSpec((None, 1, ncdp), lambda i: (i, 0, 0))]
        if get_feat:
            out_shape.append(jax.ShapeDtypeStruct((b, 1, fp), jnp.float32))
            out_specs.append(pl.BlockSpec((None, 1, fp), lambda i: (i, 0, 0)))

        outs = pl.pallas_call(
            kernel,
            out_shape=tuple(out_shape),
            grid=(b,),
            in_specs=[
                pl.BlockSpec((None, p_full, c_in), lambda i: (i, 0, 0)),   # x (per batch)
                pl.BlockSpec((ksize * ksize * c_in, fp), lambda i: (0, 0)),  # conv taps
                pl.BlockSpec((1, fp), lambda i: (0, 0)),                     # conv bias
                pl.BlockSpec((1, p_out), lambda i: (0, 0)),                  # pool vector
                pl.BlockSpec((fp, ncdp), lambda i: (0, 0)),                  # [Wcc|Wdd]
                pl.BlockSpec((1, ncdp), lambda i: (0, 0)),                   # [bcc|bdd]
            ],
            out_specs=tuple(out_specs),
            compiler_params=pltpu.CompilerParams(
                dimension_semantics=("parallel",)),
        )(xflat, wconv_p, bconv_p, pool_vec, wheads_p, bheads_p)

        heads = outs[0]
        logits = heads[:, 0, :nc]                       # [B, NC]
        dom_logits = heads[:, 0, nc:nc + nd]            # [B, ND]
        if not get_feat:
            return (logits, dom_logits)
        feats = outs[1][:, 0, :f_feat]                  # [B, F]
        return (logits, dom_logits, feats)

    return forward


# ---------------------------------------------------------------------------
# Deterministic parameter initialization (synthetic; torch-style layouts)
# ---------------------------------------------------------------------------
def init_params(key, c_in=4, f_feat=32, num_classes=10, num_domains=2, ksize=3):
    ks = jax.random.split(key, 6)
    wconv = 0.1 * jax.random.normal(ks[0], (f_feat, c_in, ksize, ksize), jnp.float32)
    bconv = 0.1 * jax.random.normal(ks[1], (f_feat,), jnp.float32)
    wcc = 0.1 * jax.random.normal(ks[2], (num_classes, f_feat), jnp.float32)
    bcc = 0.1 * jax.random.normal(ks[3], (num_classes,), jnp.float32)
    wdd = 0.1 * jax.random.normal(ks[4], (num_domains, f_feat), jnp.float32)
    bdd = 0.1 * jax.random.normal(ks[5], (num_domains,), jnp.float32)
    return dict(wconv=wconv, bconv=bconv, wcc=wcc, bcc=bcc, wdd=wdd, bdd=bdd)


def _reference_forward(x, p):
    """Pure-JAX f32 reference of the same forward pass (for a sanity check)."""
    conv = jax.lax.conv_general_dilated(
        x, p["wconv"], window_strides=(1, 1), padding="SAME",
        dimension_numbers=("NCHW", "OIHW", "NCHW"))
    act = jax.nn.relu(conv + p["bconv"][None, :, None, None])
    feats = jnp.mean(act, axis=(2, 3))
    logits = feats @ p["wcc"].T + p["bcc"]
    dom_logits = feats @ p["wdd"].T + p["bdd"]
    return logits, dom_logits, feats


if __name__ == "__main__":
    key = jax.random.PRNGKey(0)
    k_x, k_p = jax.random.split(key)

    B, C, H, W = 2, 4, 16, 16                            # NCHW input
    x = jax.random.normal(k_x, (B, C, H, W), jnp.float32)
    params = init_params(k_p, c_in=C)

    # One-time build / parameter preparation, then the fast per-call path.
    forward = build_smallnet_forward(params, H, W, get_feat=True)
    logits, dom_logits, feats = forward(x)
    jax.block_until_ready((logits, dom_logits, feats))

    assert logits.shape == (B, 10) and logits.dtype == jnp.float32
    assert dom_logits.shape == (B, 2) and dom_logits.dtype == jnp.float32
    assert feats.shape == (B, 32) and feats.dtype == jnp.float32

    # Loose numerical sanity check vs f32 reference (conv operands are bf16).
    ref_logits, ref_dom, ref_feats = _reference_forward(x, params)
    assert float(jnp.max(jnp.abs(feats - ref_feats))) < 2e-2
    assert float(jnp.max(jnp.abs(logits - ref_logits))) < 2e-2
    assert float(jnp.max(jnp.abs(dom_logits - ref_dom))) < 2e-2

    print("KERNEL_OK")
</pallas_src>

<mosaic_0001>
module attributes {stable_mosaic.version = 11 : i64} {
  func.func @kernel(%arg0: i32, %arg1: memref<1x324x4xbf16, #tpu.memory_space<vmem>>, %arg2: memref<36x128xbf16, #tpu.memory_space<vmem>>, %arg3: memref<1x128xf32, #tpu.memory_space<vmem>>, %arg4: memref<1x286xf32, #tpu.memory_space<vmem>>, %arg5: memref<128x128xf32, #tpu.memory_space<vmem>>, %arg6: memref<1x128xf32, #tpu.memory_space<vmem>>, %arg7: memref<1x1x128xf32, #tpu.memory_space<vmem>>, %arg8: memref<1x1x128xf32, #tpu.memory_space<vmem>>) attributes {dimension_semantics = [#tpu.dimension_semantics<parallel>], iteration_bounds = array<i64: 2>, scalar_prefetch = 0 : i64, scratch_operands = 0 : i64, tpu.core_type = #tpu.core_type<tc>, window_params = [{transform_indices = @transform_0, window_bounds = array<i64: 1, 324, 4>}, {pipeline_mode = #tpu.pipeline_mode<synchronous>, transform_indices = @transform_1, window_bounds = array<i64: 36, 128>}, {pipeline_mode = #tpu.pipeline_mode<synchronous>, transform_indices = @transform_2, window_bounds = array<i64: 1, 128>}, {pipeline_mode = #tpu.pipeline_mode<synchronous>, transform_indices = @transform_3, window_bounds = array<i64: 1, 286>}, {pipeline_mode = #tpu.pipeline_mode<synchronous>, transform_indices = @transform_4, window_bounds = array<i64: 128, 128>}, {pipeline_mode = #tpu.pipeline_mode<synchronous>, transform_indices = @transform_5, window_bounds = array<i64: 1, 128>}, {transform_indices = @transform_6, window_bounds = array<i64: 1, 1, 128>}, {transform_indices = @transform_7, window_bounds = array<i64: 1, 1, 128>}]} {
    %cst = arith.constant 0.000000e+00 : f32
    %0 = vector.broadcast %cst : f32 to vector<286x128xf32>
    %c0 = arith.constant 0 : index
    %c0_0 = arith.constant 0 : index
    %c0_1 = arith.constant 0 : index
    %1 = vector.load %arg1[%c0, %c0_0, %c0_1] : memref<1x324x4xbf16, #tpu.memory_space<vmem>>, vector<1x286x4xbf16>
    %2 = vector.shape_cast %1 : vector<1x286x4xbf16> to vector<286x4xbf16>
    %c0_2 = arith.constant 0 : index
    %c0_3 = arith.constant 0 : index
    %3 = vector.load %arg2[%c0_2, %c0_3] : memref<36x128xbf16, #tpu.memory_space<vmem>>, vector<4x128xbf16>
    %cst_4 = arith.constant dense<0.000000e+00> : vector<286x128xf32>
    %4 = tpu.matmul %2, %3, %cst_4 {dimension_numbers = #tpu.dot_dimension_numbers<[1], [0], [0], [1], [0, 0, 1, 1], [], []>} : vector<286x4xbf16>, vector<4x128xbf16>, vector<286x128xf32> -> vector<286x128xf32>
    %5 = arith.addf %0, %4 : vector<286x128xf32>
    %c0_5 = arith.constant 0 : index
    %c1 = arith.constant 1 : index
    %c0_6 = arith.constant 0 : index
    %6 = vector.load %arg1[%c0_5, %c1, %c0_6] : memref<1x324x4xbf16, #tpu.memory_space<vmem>>, vector<1x286x4xbf16>
    %7 = vector.shape_cast %6 : vector<1x286x4xbf16> to vector<286x4xbf16>
    %c4 = arith.constant 4 : index
    %c0_7 = arith.constant 0 : index
    %8 = vector.load %arg2[%c4, %c0_7] : memref<36x128xbf16, #tpu.memory_space<vmem>>, vector<4x128xbf16>
    %cst_8 = arith.constant dense<0.000000e+00> : vector<286x128xf32>
    %9 = tpu.matmul %7, %8, %cst_8 {dimension_numbers = #tpu.dot_dimension_numbers<[1], [0], [0], [1], [0, 0, 1, 1], [], []>} : vector<286x4xbf16>, vector<4x128xbf16>, vector<286x128xf32> -> vector<286x128xf32>
    %10 = arith.addf %5, %9 : vector<286x128xf32>
    %c0_9 = arith.constant 0 : index
    %c2 = arith.constant 2 : index
    %c0_10 = arith.constant 0 : index
    %11 = vector.load %arg1[%c0_9, %c2, %c0_10] : memref<1x324x4xbf16, #tpu.memory_space<vmem>>, vector<1x286x4xbf16>
    %12 = vector.shape_cast %11 : vector<1x286x4xbf16> to vector<286x4xbf16>
    %c8 = arith.constant 8 : index
    %c0_11 = arith.constant 0 : index
    %13 = vector.load %arg2[%c8, %c0_11] : memref<36x128xbf16, #tpu.memory_space<vmem>>, vector<4x128xbf16>
    %cst_12 = arith.constant dense<0.000000e+00> : vector<286x128xf32>
    %14 = tpu.matmul %12, %13, %cst_12 {dimension_numbers = #tpu.dot_dimension_numbers<[1], [0], [0], [1], [0, 0, 1, 1], [], []>} : vector<286x4xbf16>, vector<4x128xbf16>, vector<286x128xf32> -> vector<286x128xf32>
    %15 = arith.addf %10, %14 : vector<286x128xf32>
    %c0_13 = arith.constant 0 : index
    %c18 = arith.constant 18 : index
    %c0_14 = arith.constant 0 : index
    %16 = vector.load %arg1[%c0_13, %c18, %c0_14] : memref<1x324x4xbf16, #tpu.memory_space<vmem>>, vector<1x286x4xbf16>
    %17 = vector.shape_cast %16 : vector<1x286x4xbf16> to vector<286x4xbf16>
    %c12 = arith.constant 12 : index
    %c0_15 = arith.constant 0 : index
    %18 = vector.load %arg2[%c12, %c0_15] : memref<36x128xbf16, #tpu.memory_space<vmem>>, vector<4x128xbf16>
    %cst_16 = arith.constant dense<0.000000e+00> : vector<286x128xf32>
    %19 = tpu.matmul %17, %18, %cst_16 {dimension_numbers = #tpu.dot_dimension_numbers<[1], [0], [0], [1], [0, 0, 1, 1], [], []>} : vector<286x4xbf16>, vector<4x128xbf16>, vector<286x128xf32> -> vector<286x128xf32>
    %20 = arith.addf %15, %19 : vector<286x128xf32>
    %c0_17 = arith.constant 0 : index
    %c19 = arith.constant 19 : index
    %c0_18 = arith.constant 0 : index
    %21 = vector.load %arg1[%c0_17, %c19, %c0_18] : memref<1x324x4xbf16, #tpu.memory_space<vmem>>, vector<1x286x4xbf16>
    %22 = vector.shape_cast %21 : vector<1x286x4xbf16> to vector<286x4xbf16>
    %c16 = arith.constant 16 : index
    %c0_19 = arith.constant 0 : index
    %23 = vector.load %arg2[%c16, %c0_19] : memref<36x128xbf16, #tpu.memory_space<vmem>>, vector<4x128xbf16>
    %cst_20 = arith.constant dense<0.000000e+00> : vector<286x128xf32>
    %24 = tpu.matmul %22, %23, %cst_20 {dimension_numbers = #tpu.dot_dimension_numbers<[1], [0], [0], [1], [0, 0, 1, 1], [], []>} : vector<286x4xbf16>, vector<4x128xbf16>, vector<286x128xf32> -> vector<286x128xf32>
    %25 = arith.addf %20, %24 : vector<286x128xf32>
    %c0_21 = arith.constant 0 : index
    %c20 = arith.constant 20 : index
    %c0_22 = arith.constant 0 : index
    %26 = vector.load %arg1[%c0_21, %c20, %c0_22] : memref<1x324x4xbf16, #tpu.memory_space<vmem>>, vector<1x286x4xbf16>
    %27 = vector.shape_cast %26 : vector<1x286x4xbf16> to vector<286x4xbf16>
    %c20_23 = arith.constant 20 : index
    %c0_24 = arith.constant 0 : index
    %28 = vector.load %arg2[%c20_23, %c0_24] : memref<36x128xbf16, #tpu.memory_space<vmem>>, vector<4x128xbf16>
    %cst_25 = arith.constant dense<0.000000e+00> : vector<286x128xf32>
    %29 = tpu.matmul %27, %28, %cst_25 {dimension_numbers = #tpu.dot_dimension_numbers<[1], [0], [0], [1], [0, 0, 1, 1], [], []>} : vector<286x4xbf16>, vector<4x128xbf16>, vector<286x128xf32> -> vector<286x128xf32>
    %30 = arith.addf %25, %29 : vector<286x128xf32>
    %c0_26 = arith.constant 0 : index
    %c36 = arith.constant 36 : index
    %c0_27 = arith.constant 0 : index
    %31 = vector.load %arg1[%c0_26, %c36, %c0_27] : memref<1x324x4xbf16, #tpu.memory_space<vmem>>, vector<1x286x4xbf16>
    %32 = vector.shape_cast %31 : vector<1x286x4xbf16> to vector<286x4xbf16>
    %c24 = arith.constant 24 : index
    %c0_28 = arith.constant 0 : index
    %33 = vector.load %arg2[%c24, %c0_28] : memref<36x128xbf16, #tpu.memory_space<vmem>>, vector<4x128xbf16>
    %cst_29 = arith.constant dense<0.000000e+00> : vector<286x128xf32>
    %34 = tpu.matmul %32, %33, %cst_29 {dimension_numbers = #tpu.dot_dimension_numbers<[1], [0], [0], [1], [0, 0, 1, 1], [], []>} : vector<286x4xbf16>, vector<4x128xbf16>, vector<286x128xf32> -> vector<286x128xf32>
    %35 = arith.addf %30, %34 : vector<286x128xf32>
    %c0_30 = arith.constant 0 : index
    %c37 = arith.constant 37 : index
    %c0_31 = arith.constant 0 : index
    %36 = vector.load %arg1[%c0_30, %c37, %c0_31] : memref<1x324x4xbf16, #tpu.memory_space<vmem>>, vector<1x286x4xbf16>
    %37 = vector.shape_cast %36 : vector<1x286x4xbf16> to vector<286x4xbf16>
    %c28 = arith.constant 28 : index
    %c0_32 = arith.constant 0 : index
    %38 = vector.load %arg2[%c28, %c0_32] : memref<36x128xbf16, #tpu.memory_space<vmem>>, vector<4x128xbf16>
    %cst_33 = arith.constant dense<0.000000e+00> : vector<286x128xf32>
    %39 = tpu.matmul %37, %38, %cst_33 {dimension_numbers = #tpu.dot_dimension_numbers<[1], [0], [0], [1], [0, 0, 1, 1], [], []>} : vector<286x4xbf16>, vector<4x128xbf16>, vector<286x128xf32> -> vector<286x128xf32>
    %40 = arith.addf %35, %39 : vector<286x128xf32>
    %c0_34 = arith.constant 0 : index
    %c38 = arith.constant 38 : index
    %c0_35 = arith.constant 0 : index
    %41 = vector.load %arg1[%c0_34, %c38, %c0_35] : memref<1x324x4xbf16, #tpu.memory_space<vmem>>, vector<1x286x4xbf16>
    %42 = vector.shape_cast %41 : vector<1x286x4xbf16> to vector<286x4xbf16>
    %c32 = arith.constant 32 : index
    %c0_36 = arith.constant 0 : index
    %43 = vector.load %arg2[%c32, %c0_36] : memref<36x128xbf16, #tpu.memory_space<vmem>>, vector<4x128xbf16>
    %cst_37 = arith.constant dense<0.000000e+00> : vector<286x128xf32>
    %44 = tpu.matmul %42, %43, %cst_37 {dimension_numbers = #tpu.dot_dimension_numbers<[1], [0], [0], [1], [0, 0, 1, 1], [], []>} : vector<286x4xbf16>, vector<4x128xbf16>, vector<286x128xf32> -> vector<286x128xf32>
    %45 = arith.addf %40, %44 : vector<286x128xf32>
    %c0_38 = arith.constant 0 : index
    %c0_39 = arith.constant 0 : index
    %46 = vector.load %arg3[%c0_38, %c0_39] : memref<1x128xf32, #tpu.memory_space<vmem>>, vector<1x128xf32>
    %47 = vector.broadcast %46 : vector<1x128xf32> to vector<286x128xf32>
    %48 = arith.addf %45, %47 : vector<286x128xf32>
    %cst_40 = arith.constant 0.000000e+00 : f32
    %49 = vector.broadcast %cst_40 : f32 to vector<286x128xf32>
    %50 = arith.maximumf %48, %49 : vector<286x128xf32>
    %c0_41 = arith.constant 0 : index
    %c0_42 = arith.constant 0 : index
    %51 = vector.load %arg4[%c0_41, %c0_42] : memref<1x286xf32, #tpu.memory_space<vmem>>, vector<1x286xf32>
    %cst_43 = arith.constant dense<0.000000e+00> : vector<1x128xf32>
    %52 = tpu.matmul %51, %50, %cst_43 {dimension_numbers = #tpu.dot_dimension_numbers<[1], [0], [0], [1], [0, 0, 1, 1], [], []>} : vector<1x286xf32>, vector<286x128xf32>, vector<1x128xf32> -> vector<1x128xf32>
    %c0_44 = arith.constant 0 : index
    %c0_45 = arith.constant 0 : index
    %53 = vector.load %arg5[%c0_44, %c0_45] : memref<128x128xf32, #tpu.memory_space<vmem>>, vector<128x128xf32>
    %cst_46 = arith.constant dense<0.000000e+00> : vector<1x128xf32>
    %54 = tpu.matmul %52, %53, %cst_46 {dimension_numbers = #tpu.dot_dimension_numbers<[1], [0], [0], [1], [0, 0, 1, 1], [], []>} : vector<1x128xf32>, vector<128x128xf32>, vector<1x128xf32> -> vector<1x128xf32>
    %c0_47 = arith.constant 0 : index
    %c0_48 = arith.constant 0 : index
    %55 = vector.load %arg6[%c0_47, %c0_48] : memref<1x128xf32, #tpu.memory_space<vmem>>, vector<1x128xf32>
    %56 = arith.addf %54, %55 : vector<1x128xf32>
    %c0_49 = arith.constant 0 : index
    %c0_50 = arith.constant 0 : index
    %c0_51 = arith.constant 0 : index
    %57 = vector.load %arg7[%c0_49, %c0_50, %c0_51] : memref<1x1x128xf32, #tpu.memory_space<vmem>>, vector<1x1x128xf32>
    %58 = vector.shape_cast %57 : vector<1x1x128xf32> to vector<1x128xf32>
    %59 = vector.shape_cast %56 : vector<1x128xf32> to vector<1x1x128xf32>
    tpu.vector_store %arg7[%c0_49, %c0_50, %c0_51], %59 {strides = array<i32>} : memref<1x1x128xf32, #tpu.memory_space<vmem>>, vector<1x1x128xf32>,
    %c0_52 = arith.constant 0 : index
    %c0_53 = arith.constant 0 : index
    %c0_54 = arith.constant 0 : index
    %60 = vector.load %arg8[%c0_52, %c0_53, %c0_54] : memref<1x1x128xf32, #tpu.memory_space<vmem>>, vector<1x1x128xf32>
    %61 = vector.shape_cast %60 : vector<1x1x128xf32> to vector<1x128xf32>
    %62 = vector.shape_cast %52 : vector<1x128xf32> to vector<1x1x128xf32>
    tpu.vector_store %arg8[%c0_52, %c0_53, %c0_54], %62 {strides = array<i32>} : memref<1x1x128xf32, #tpu.memory_space<vmem>>, vector<1x1x128xf32>,
    return
  }
  func.func @transform_0(%arg0: i32) -> (i32, i32, i32) {
    %c0_i32 = arith.constant 0 : i32
    %c0_i32_0 = arith.constant 0 : i32
    %c0_i32_1 = arith.constant 0 : i32
    return %arg0, %c0_i32, %c0_i32_0 : i32, i32, i32
  }
  func.func @transform_1(%arg0: i32) -> (i32, i32) {
    %c0_i32 = arith.constant 0 : i32
    %c0_i32_0 = arith.constant 0 : i32
    %c0_i32_1 = arith.constant 0 : i32
    return %c0_i32, %c0_i32_0 : i32, i32
  }
  func.func @transform_2(%arg0: i32) -> (i32, i32) {
    %c0_i32 = arith.constant 0 : i32
    %c0_i32_0 = arith.constant 0 : i32
    %c0_i32_1 = arith.constant 0 : i32
    return %c0_i32, %c0_i32_0 : i32, i32
  }
  func.func @transform_3(%arg0: i32) -> (i32, i32) {
    %c0_i32 = arith.constant 0 : i32
    %c0_i32_0 = arith.constant 0 : i32
    %c0_i32_1 = arith.constant 0 : i32
    return %c0_i32, %c0_i32_0 : i32, i32
  }
  func.func @transform_4(%arg0: i32) -> (i32, i32) {
    %c0_i32 = arith.constant 0 : i32
    %c0_i32_0 = arith.constant 0 : i32
    %c0_i32_1 = arith.constant 0 : i32
    return %c0_i32, %c0_i32_0 : i32, i32
  }
  func.func @transform_5(%arg0: i32) -> (i32, i32) {
    %c0_i32 = arith.constant 0 : i32
    %c0_i32_0 = arith.constant 0 : i32
    %c0_i32_1 = arith.constant 0 : i32
    return %c0_i32, %c0_i32_0 : i32, i32
  }
  func.func @transform_6(%arg0: i32) -> (i32, i32, i32) {
    %c0_i32 = arith.constant 0 : i32
    %c0_i32_0 = arith.constant 0 : i32
    %c0_i32_1 = arith.constant 0 : i32
    return %arg0, %c0_i32, %c0_i32_0 : i32, i32, i32
  }
  func.func @transform_7(%arg0: i32) -> (i32, i32, i32) {
    %c0_i32 = arith.constant 0 : i32
    %c0_i32_0 = arith.constant 0 : i32
    %c0_i32_1 = arith.constant 0 : i32
    return %arg0, %c0_i32, %c0_i32_0 : i32, i32, i32
  }
}

</mosaic_0001>

<bundles_post_ra>
// kernel: forward.1
= control target key start
LH: loop header
LB: loop body
LE: loop exit
PB: predicated region body
PF: predicated region fallthrough
CT: control target
= control target key end

     0   :  { %13 = vsyncpa [#allocation3], 0  ;;  %s7017_s0 = inlined_call_operand.vmem [shape: bf16[2,324,4], index: 0, kind: input, shape index: {}]   ;;  %s7018_s1 = inlined_call_operand.vmem [shape: bf16[36,128], index: 1, kind: input, shape index: {}]   ;;  %s7019_s2 = inlined_call_operand.vmem [shape: f32[1,128], index: 2, kind: input, shape index: {}]   ;;  %s7020_s3 = inlined_call_operand.vmem [shape: f32[1,286], index: 3, kind: input, shape index: {}]   ;;  %s7021_s4 = inlined_call_operand.vmem [shape: f32[128,128], index: 4, kind: input, shape index: {}]   ;;  %s7022_s5 = inlined_call_operand.vmem [shape: f32[1,128], index: 5, kind: input, shape index: {}]   ;;  %s7023_s6 = inlined_call_operand.vmem [shape: f32[2,1,128], index: 6, kind: output, shape index: {0}]   ;;  %s7024_s7 = inlined_call_operand.hbm [shape: f32[2,1,128], index: 7, kind: output, shape index: {1}]  }
   0x1   :  { %15 = vsyncpa [#allocation3 + $0x1], 0  ;;  %s5390_s24 = smov 0   ;;  %s5392_s25 = smov 0  }
   0x2   :  { %s5394_s26 = smov 0   ;;  %s5396_s27 = smov 0  }
   0x3 LB: > { %s5411_s28 = sadd.s32 4294967295, %s5345_s27   ;;  %s4276_s29 = sadd.s32 4294967294, %s5345_s27   ;;  %s5345_s27 = sphi %s5396_s27, %s7126_s27   ;;  %s5341_s26 = sphi %s5394_s26, %s7125_s26   ;;  %s5337_s25 = sphi %s5392_s25, %s7124_s25   ;;  %s5333_s24 = sphi %s5390_s24, %s7123_s24  }
   0x4   : > { %s5415_s30 = sadd.s32 1, %s5345_s27   ;;  %s185_s8 = sadd.s32 1, %s5341_s26 }
   0x5   : > { %s182_s9 = ssub.s32 %s5345_s27, %s5415_s30  ;;  %p195_p0 = scmp.ne.s32.totalorder %s5341_s26, %s5337_s25 }
   0x6   : > { %p183_p1 = scmp.eq.s32.totalorder %s182_s9, 0  ;;  %p196_p2 = scmp.eq.s32.totalorder %s5411_s28, 1 }
   0x7   : > { %p201_p3 = scmp.ne.s32.totalorder %s5337_s25, %s5333_s24  ;;  %p202_p4 = scmp.eq.s32.totalorder %s4276_s29, 1 }
   0x8   : > { %s5426_s10 = scalar_select %p183_p1, %s5341_s26, %s185_s8  }
   0x9   : > { %p5428_p5 = por %p196_p2, %p195_p0  ;;  %p5432_p6 = por %p202_p4, %p201_p3 }
   0xa   : > { %p4279_p7 = scmp.ge.s32.totalorder %s5345_s27, 1  ;;  %p243_p8 = scmp.lt.s32.totalorder %s5345_s27, 3 }
   0xc   : > { %p244_p9 = pnand %p4279_p7, %p243_p8 }
   0xe   : > { %247 = sbr.rel (%p244_p9) target bundleno = 1007 (0x3ef), region = 44 }
  0x13   : > { %v5202_v0 = vld [vmem:[%s7018_s1] ss:$0 sps:$4 sm:$0xcc]   ;;  %vm618_vm0 = vcmask 1041408   ;;  %p277_p10 = scmp.lt.s32.totalorder %s5411_s28, 1  ;;  %vm563_vm2 = vcmask 31744  }
  0x14   : > { %v562_v1 = vrot.slane %v5202_v0, 2  ;;  %v322_v2 = vld [vmem:[%s7018_s1] sm:$0x3]  ;;  %v1020_v3 = vld [vmem:[%s7018_s1 + $0x4] sm:$0x3]  ;;  %vm1024_vm3 = vcmask 1046528  }
  0x15   : > { %s5446_s17 = scalar_select %p277_p10, %s5411_s28, 1  ;;  %vm415_vm1 = vsmask.f32 7424  ;;  %v840_v5 = vsel %vm618_vm0, %v322_v2, 0  ;;  %v1115_v10 = vsel %vm618_vm0, %v1020_v3, 0  ;;  %vm2339_vm5 = vcmask 1045504  }
  0x16   : > { %5150 = vmatprep.subr.msk.bf16.mxu0 %vm618_vm0, %v562_v1  ;;  %5151 = vmatprep.subr.msk.bf16.mxu1 %vm618_vm0, %v562_v1  ;;  %v620_v4 = vsel %vm618_vm0, %v562_v1, 0  ;;  %v5223_v24 = vld [vmem:[%s7018_s1 + $0x4] ss:$0 sps:$4 sm:$0xcc]   ;;  %v5526_v54 = vld [vmem:[%s7018_s1 + $0x8] sm:$0x3] }
  0x17   : > { %4761 = vmatpush3.bf16.msra.mxu0 %v620_v4  ;;  %5149 = vmatpush3.bf16.msra.mxu1 %v620_v4  ;;  %s5160_s20 = smul.u32 164, %s5446_s17  ;;  %v1495_v51 = vrot.slane %v5223_v24, 2  ;;  %vm1897_vm4 = vsmask.f32 6400  ;;  %vm3094_vm6 = vsmask.f32 5376 }
  0x18   : > { %5152 = vmatprep.subr.msk.bf16.mxu1 %vm618_vm0, %v322_v2  ;;  %5153 = vmatprep.subr.msk.bf16.mxu0 %vm618_vm0, %v1020_v3  ;;  %vm3544_vm7 = vcmask 1044480   ;;  %vm5348_vm8 = vmmov 0   ;;  %vm3947_vm9 = vcmask 244736   ;;  %s4529_s22 = sshll.u32 %s5411_s28, 4  ;;  %s5349_s15 = smov [#allocation2]  }
  0x19   : > { %s5460_s23 = scalar_lea.vmem %s7017_s0, %s5160_s20  ;;  %v1551_v0 = vsel %vm618_vm0, %v1495_v51, 0  ;;  %s275_s20 = sand.u32 1, %s5337_s25  }
  0x1a   : > { %v286_v6 = vld [vmem:[%s5460_s23] sm:$0xf]  ;;  %v5465_v7 = vld [vmem:[%s5460_s23 + $0x4] sm:$0xf]  ;;  %v5469_v9 = vld [vmem:[%s5460_s23 + $0x8] sm:$0xff]   ;;  %s276_s21 = scalar_lea.vmem [#allocation2], %s275_s20  ;;  %s4200_s8 = scalar_lea.hbm %s7024_s7, %s4529_s22 }
  0x1b   : > { %v4281_v8 = vcombine.low %v286_v6, %v5465_v7  ;;  %v5473_v11 = vld [vmem:[%s5460_s23 + $0x88] sm:$0xf]  ;;  %v323_v12 = vld [vmem:[%s5460_s23 + $0x8c] sm:$0xf]  ;;  %v424_v15 = vshll.u32 %v5469_v9, 16  ;;  %v428_v16 = vshrl.u32 %v5469_v9, 16 }
  0x1c   : > { %v5479_v17 = vld [vmem:[%s5460_s23 + $0x80] sm:$0xff]   ;;  %v5482_v18 = vld [vmem:[%s5460_s23 + $0x10] sm:$0xff]   ;;  %v5485_v19 = vcombine.low %v5473_v11, %v323_v12  ;;  %v5496_v28 = vld [vmem:[%s5460_s23 + $0x18] sm:$0xff]   ;;  %s4202_s9 = sshll.u32 %s276_s21, 4  ;;  %s4187_s13 = scalar_lea.sflag [#allocation3], %s275_s20  ;;  %s4203_s9 = int_to_ptr.vmem [resolvable:$true] %s4202_s9 }
  0x1d   : > { %v417_v13 = vshrl.u32 %v4281_v8, 16  ;;  %v419_v14 = vshll.u32 %v4281_v8, 16  ;;  %v426_v21 = vrot.slane %v424_v15, 1  ;;  %v544_v22 = vshll.u32 %v5479_v17, 16  ;;  %v5500_v30 = vld [vmem:[%s5460_s23 + $0x20] sm:$0xff]   ;;  %v5505_v34 = vld [vmem:[%s5460_s23 + $0x28] sm:$0xff]  }
  0x1e   : > { %v548_v23 = vshrl.u32 %v5479_v17, 16  ;;  %v552_v25 = vshll.u32 %v5485_v19, 16  ;;  %v556_v26 = vshrl.u32 %v5485_v19, 16  ;;  %v432_v27 = vshll.u32 %v5482_v18, 16  ;;  %v5519_v50 = vld [vmem:[%s5460_s23 + $0x30] sm:$0xff]   ;;  %v5531_v57 = vld [vmem:[%s5460_s23 + $0x38] sm:$0xff]  }
  0x1f   : > { %v421_v20 = vrot.slane %v419_v14, 1  ;;  %v436_v29 = vshrl.u32 %v5482_v18, 16  ;;  %v430_v32 = vor.u32 %v428_v16, %v426_v21  ;;  %v5502_v33 = vrot.slane %v544_v22, 1  ;;  %v5546_v2 = vld [vmem:[%s5460_s23 + $0x40] sm:$0xff]   ;;  %v5552_v6 = vld [vmem:[%s5460_s23 + $0x48] sm:$0xff]   ;;  %v5563_v16 = vld [vmem:[%s5460_s23 + $0x50] sm:$0xff]  }
  0x20   : > { %v554_v35 = vrot.slane %v552_v25, 1  ;;  %v434_v36 = vrot.slane %v432_v27, 1  ;;  %v440_v37 = vshll.u32 %v5496_v28, 16  ;;  %v444_v38 = vshrl.u32 %v5496_v28, 16  ;;  %v5570_v24 = vld [vmem:[%s5460_s23 + $0x58] sm:$0xff]   ;;  %s5285_s14 = scalar_lea.vmem %s4203_s9, 16 }
  0x21   : > { %v422_v31 = vor.u32 %v421_v20, %v417_v13  ;;  %v550_v40 = vor.u32 %v548_v23, %v5502_v33  ;;  %v448_v41 = vshll.u32 %v5500_v30, 16  ;;  %v452_v42 = vshrl.u32 %v5500_v30, 16  ;;  %p5286_p11 = scmp.ne.s32.totalorder %s4203_s9, %s5285_s14  ;;  %s5289_s16 = sshll.u32 %s5349_s15, 4  ;;  %s5290_s16 = int_to_ptr.vmem [resolvable:$false] %s5289_s16 }
  0x22   : > { %v558_v43 = vor.u32 %v556_v26, %v554_v35  ;;  %v435_v44 = vsel %vm415_vm1, %v430_v32, %v434_v36  ;;  %v438_v45 = vor.u32 %v436_v29, %v434_v36  ;;  %v442_v46 = vrot.slane %v440_v37, 1  ;;  %s5291_s18 = scalar_lea.vmem %s5290_s16, 32  ;;  %p5292_p0 = scmp.lt.s32.totalorder %s4203_s9, %s5290_s16 }
  0x23   : > { %v427_v39 = vsel %vm415_vm1, %v422_v31, %v426_v21  ;;  %v555_v47 = vsel %vm415_vm1, %v550_v40, %v554_v35  ;;  %v450_v48 = vrot.slane %v448_v41, 1  ;;  %v456_v49 = vshll.u32 %v5505_v34, 16  ;;  %v5597_v41 = vld [vmem:[%s5460_s23 + $0x60] sm:$0xff]   ;;  %p5287_p12 = pnand %p5286_p11, %p5428_p5  ;;  %p5293_p1 = scmp.lt.s32.totalorder %s5291_s18, %s5285_s14 }
  0x24   : > { %4762 = vmatprep.mubr.msk.bf16.mxu0 %vm563_vm2, %v427_v39  ;;  %4794 = vmatprep.mubr.msk.bf16.mxu1 %vm563_vm2, %v555_v47  ;;  %v443_v52 = vsel %vm415_vm1, %v438_v45, %v442_v46  ;;  %v446_v53 = vor.u32 %v444_v38, %v442_v46  ;;  %v464_v58 = vshll.u32 %v5519_v50, 16  ;;  %v460_v60 = vshrl.u32 %v5505_v34, 16  ;;  %v5605_v45 = vld [vmem:[%s5460_s23 + $0x68] sm:$0xff]  }
  0x25   : > { %4763 = vmatmul.mubr.msk.bf16.vlgmr.msra.gmra.mxu0 %vm563_vm2, %v435_v44  ;;  %4795 = vmatmul.mubr.msk.bf16.vlgmr.msra.gmra.mxu1 %vm563_vm2, %v558_v43  ;;  %v454_v55 = vor.u32 %v452_v42, %v450_v48  ;;  %v458_v56 = vrot.slane %v456_v49, 1  ;;  %v468_v62 = vshrl.u32 %v5519_v50, 16  ;;  %v472_v63 = vshll.u32 %v5531_v57, 16  ;;  %p5288_p13 = pneg %p5287_p12  ;;  %p5294_p2 = por %p5293_p1, %p5292_p0 }
  0x26   : > { %4837 = vmatpush3.bf16.msra.mxu0 %v1115_v10  ;;  %4766 = vmatprep.mubr.msk.bf16.mxu0 %vm563_vm2, %v443_v52  ;;  %v451_v59 = vsel %vm415_vm1, %v446_v53, %v450_v48  ;;  %v466_v1 = vrot.slane %v464_v58, 1  ;;  %v476_v12 = vshrl.u32 %v5531_v57, 16  ;;  %v484_v14 = vshrl.u32 %v5546_v2, 16 }
  0x27   : > { %4799 = vmatpush3.bf16.msra.mxu1 %v840_v5  ;;  %4800 = vmatprep.mubr.msk.bf16.mxu1 %vm563_vm2, %v4281_v8  ;;  %v459_v61 = vsel %vm415_vm1, %v454_v55, %v458_v56  ;;  %v462_v3 = vor.u32 %v460_v60, %v458_v56  ;;  %v474_v5 = vrot.slane %v472_v63, 1  ;;  %v480_v8 = vshll.u32 %v5546_v2, 16  ;;  %v5618_v55 = vld [vmem:[%s5460_s23 + $0x70] sm:$0xff]   ;;  %v5621_v56 = vld [vmem:[%s5460_s23 + $0x78] sm:$0xff]   ;;  %p5295_p3 = pnand %p5294_p2, %p5288_p13 }
  0x28   : > { %5154 = vmatprep.subr.msk.bf16.mxu1 %vm618_vm0, %v1495_v51  ;;  %5155 = vmatprep.subr.msk.bf16.mxu0 %vm618_vm0, %v5526_v54  ;;  %v470_v4 = vor.u32 %v468_v62, %v466_v1  ;;  %v488_v15 = vshll.u32 %v5552_v6, 16  ;;  %v1028_v20 = vrot.slane %v5482_v18, 1  ;;  %v1030_v21 = vrot.slane %v5496_v28, 1 }
  0x29   : > { %v467_v10 = vsel %vm415_vm1, %v462_v3, %v466_v1  ;;  %v482_v22 = vrot.slane %v480_v8, 1  ;;  %v478_v23 = vor.u32 %v476_v12, %v474_v5  ;;  %v1032_v26 = vrot.slane %v5500_v30, 1 }
  0x2a   : > { %v475_v13 = vsel %vm415_vm1, %v470_v4, %v474_v5  ;;  %v5575_v25 = vsel %vm1024_vm3, %v1028_v20, %v1030_v21  ;;  %v490_v29 = vrot.slane %v488_v15, 1  ;;  %v492_v31 = vshrl.u32 %v5552_v6, 16 }
  0x2b   : > { %v486_v27 = vor.u32 %v484_v14, %v482_v22  ;;  %v1034_v32 = vrot.slane %v5505_v34, 1  ;;  %v496_v35 = vshll.u32 %v5563_v16, 16  ;;  %v5586_v36 = vsel %vm1024_vm3, %v1030_v21, %v1032_v26 }
  0x2c   : > { %v1036_v37 = vrot.slane %v5519_v50, 1  ;;  %v500_v38 = vshrl.u32 %v5563_v16, 16  ;;  %v1038_v39 = vrot.slane %v5531_v57, 1  ;;  %v483_v40 = vsel %vm415_vm1, %v478_v23, %v482_v22 }
  0x2d   : > { %4767 = vmatmul.mubr.msk.bf16.gmra.mxu0 %vm563_vm2, %v451_v59  ;;  %4801 = vmatmul.mubr.msk.bf16.vlgmr.msra.gmra.mxu1 %vm563_vm2, %v5469_v9  ;;  %v1040_v43 = vrot.slane %v5546_v2, 1  ;;  %v491_v44 = vsel %vm415_vm1, %v486_v27, %v490_v29  ;;  %v1042_v47 = vrot.slane %v5552_v6, 1  ;;  %v498_v48 = vrot.slane %v496_v35, 1 }
  0x2e   : > { %4770 = vmatprep.mubr.msk.bf16.mxu0 %vm563_vm2, %v459_v61  ;;  %4804 = vmatprep.mubr.msk.bf16.mxu1 %vm563_vm2, %v5482_v18  ;;  %v5600_v42 = vsel %vm1024_vm3, %v1034_v32, %v1036_v37  ;;  %v5608_v46 = vsel %vm1024_vm3, %v1036_v37, %v1038_v39  ;;  %v1044_v51 = vrot.slane %v5563_v16, 1  ;;  %v494_v52 = vor.u32 %v492_v31, %v490_v29  ;;  %v321_v18 = vld [vmem:[%s5460_s23 + $0x8c] sm:$0x7] }
  0x2f   : > { %4875 = vmatpush3.bf16.msra.mxu1 %v1551_v0  ;;  %v5612_v49 = vsel %vm1024_vm3, %v1038_v39, %v1040_v43  ;;  %v508_v53 = vshrl.u32 %v5570_v24, 16  ;;  %v5624_v58 = vsel %vm1024_vm3, %v1040_v43, %v1042_v47  ;;  %v1046_v59 = vrot.slane %v5570_v24, 1 }
  0x30   : > { %v5629_v60 = vsel %vm1024_vm3, %v1042_v47, %v1044_v51  ;;  %v1048_v61 = vrot.slane %v5597_v41, 1  ;;  %v1050_v62 = vrot.slane %v5605_v45, 1  ;;  %v502_v63 = vor.u32 %v500_v38, %v498_v48  ;;  %v1019_v47 = vld [vmem:[%s5460_s23] sm:$0xe] }
  0x31   : > { %v512_v1 = vshll.u32 %v5597_v41, 16  ;;  %v5637_v3 = vsel %vm1024_vm3, %v1044_v51, %v1046_v59  ;;  %v1052_v8 = vrot.slane %v5618_v55, 1  ;;  %v516_v12 = vshrl.u32 %v5597_v41, 16 }
  0x32   : > { %v5642_v4 = vsel %vm1024_vm3, %v1046_v59, %v1048_v61  ;;  %v5645_v5 = vsel %vm1024_vm3, %v1048_v61, %v1050_v62  ;;  %v1056_v15 = vrot.slane %v5479_v17, 1  ;;  %v1058_v21 = vrot.slane %v5485_v19, 1 }
  0x33   : > { %v5653_v14 = vsel %vm1024_vm3, %v1050_v62, %v1052_v8  ;;  %v524_v37 = vshrl.u32 %v5605_v45, 16  ;;  %v532_v39 = vshrl.u32 %v5618_v55, 16  ;;  %v4337_v59 = vcombine.low %v1019_v47, %v5465_v7 }
  0x34   : > { %v5668_v23 = vsel %vm1024_vm3, %v1056_v15, %v1058_v21  ;;  %v1026_v61 = vrot.slane %v5469_v9, 1 }
  0x35   : > { %4771 = vmatmul.mubr.msk.bf16.gmra.mxu0 %vm563_vm2, %v467_v10  ;;  %4805 = vmatmul.mubr.msk.bf16.gmra.mxu1 %vm563_vm2, %v5496_v28  ;;  %v5591_v28 = vsel %vm1024_vm3, %v1032_v26, %v1034_v32  ;;  %v499_v10 = vsel %vm415_vm1, %v494_v52, %v498_v48  ;;  %v514_v26 = vrot.slane %v512_v1, 1  ;;  %v528_v32 = vshll.u32 %v5618_v55, 16 }
  0x36   : > { %4774 = vmatprep.mubr.msk.bf16.mxu0 %vm563_vm2, %v475_v13  ;;  %4808 = vmatprep.mubr.msk.bf16.mxu1 %vm563_vm2, %v5500_v30  ;;  %v504_v30 = vshll.u32 %v5570_v24, 16  ;;  %v520_v13 = vshll.u32 %v5605_v45, 16  ;;  %v540_v52 = vshrl.u32 %v5621_v56, 16  ;;  %v1029_v9 = vsel %vm1024_vm3, %v1026_v61, %v1028_v20 }
  0x37   : > { %v518_v29 = vor.u32 %v516_v12, %v514_v26  ;;  %v5229_v12 = vld [vmem:[%s5460_s23 + $0x30] sm:$0xff]  }
  0x38   : > { %v506_v0 = vrot.slane %v504_v30, 1  ;;  %v522_v31 = vrot.slane %v520_v13, 1 }
  0x3a   : > { %v507_v22 = vsel %vm415_vm1, %v502_v63, %v506_v0  ;;  %v510_v27 = vor.u32 %v508_v53, %v506_v0  ;;  %v523_v38 = vsel %vm415_vm1, %v518_v29, %v522_v31  ;;  %v526_v30 = vor.u32 %v524_v37, %v522_v31  ;;  %v5227_v0 = vld [vmem:[%s5460_s23 + $0x20] sm:$0xff]  }
  0x3b   : > { %v4318_v63 = vcombine.low %v5473_v11, %v321_v18  ;;  %v5228_v11 = vld [vmem:[%s5460_s23 + $0x28] sm:$0xff]   ;;  %v5231_v29 = vld [vmem:[%s5460_s23 + $0x40] sm:$0xff]  }
  0x3c   : > { %v515_v35 = vsel %vm415_vm1, %v510_v27, %v514_v26  ;;  %v5230_v27 = vld [vmem:[%s5460_s23 + $0x38] sm:$0xff]   ;;  %v5824_v18 = vld [vmem:[%s5460_s23 + $0x20] sm:$0xff]  }
  0x3d   : > { %4775 = vmatmul.mubr.msk.bf16.gmra.mxu0 %vm563_vm2, %v483_v40  ;;  %4809 = vmatmul.mubr.msk.bf16.gmra.mxu1 %vm563_vm2, %v5505_v34  ;;  %v1054_v34 = vrot.slane %v5621_v56, 1  ;;  %v536_v40 = vshll.u32 %v5621_v56, 16  ;;  %v1468_v31 = vrot.slane %v5230_v27, 1 }
  0x3e   : > { %4778 = vmatprep.mubr.msk.bf16.mxu0 %vm563_vm2, %v491_v44  ;;  %4812 = vmatprep.mubr.msk.bf16.mxu1 %vm563_vm2, %v5519_v50 }
  0x3f   : > { %v5658_v50 = vsel %vm1024_vm3, %v1052_v8, %v1054_v34  ;;  %v538_v44 = vrot.slane %v536_v40, 1  ;;  %v1462_v8 = vrot.slane %v5227_v0, 1  ;;  %v1928_v0 = vshll.u32 %v5824_v18, 16 }
  0x45   : > { %4779 = vmatmul.mubr.msk.bf16.gmra.mxu0 %vm563_vm2, %v499_v10  ;;  %4813 = vmatmul.mubr.msk.bf16.gmra.mxu1 %vm563_vm2, %v5531_v57  ;;  %v530_v57 = vrot.slane %v528_v32, 1  ;;  %v1470_v32 = vrot.slane %v5231_v29, 1 }
  0x46   : > { %4782 = vmatprep.mubr.msk.bf16.mxu0 %vm563_vm2, %v507_v22  ;;  %4816 = vmatprep.mubr.msk.bf16.mxu1 %vm563_vm2, %v5546_v2  ;;  %v5247_v2 = vld [vmem:[%s7018_s1 + $0x8] ss:$0 sps:$4 sm:$0xcc]   ;;  %v1466_v22 = vrot.slane %v5229_v12, 1 }
  0x47   : > { %v534_v43 = vor.u32 %v532_v39, %v530_v57  ;;  %v2380_v48 = vrot.slane %v5247_v2, 2  ;;  %v531_v51 = vsel %vm415_vm1, %v526_v30, %v530_v57  ;;  %v1471_v37 = vsel %vm1024_vm3, %v1468_v31, %v1470_v32  ;;  %v5234_v30 = vld [vmem:[%s5460_s23 + $0x58] sm:$0xff]   ;;  %v5235_v2 = vld [vmem:[%s5460_s23 + $0x60] sm:$0xff]  }
  0x48   : > { %v1478_v47 = vrot.slane %v5235_v2, 1 }
  0x49   : > { %5156 = vmatprep.subr.msk.bf16.mxu1 %vm618_vm0, %v2380_v48  ;;  %v539_v53 = vsel %vm415_vm1, %v534_v43, %v538_v44  ;;  %v2436_v13 = vsel %vm618_vm0, %v2380_v48, 0  ;;  %v1766_v43 = vld [vmem:[%s5460_s23 + $0x8] sm:$0xe] }
  0x4d   : > { %4783 = vmatmul.mubr.msk.bf16.gmra.mxu0 %vm563_vm2, %v515_v35  ;;  %4817 = vmatmul.mubr.msk.bf16.gmra.mxu1 %vm563_vm2, %v5552_v6  ;;  %v542_v6 = vor.u32 %v540_v52, %v538_v44  ;;  %v5232_v35 = vld [vmem:[%s5460_s23 + $0x48] sm:$0xff]  }
  0x4e   : > { %4786 = vmatprep.mubr.msk.bf16.mxu0 %vm563_vm2, %v523_v38  ;;  %4820 = vmatprep.mubr.msk.bf16.mxu1 %vm563_vm2, %v5563_v16  ;;  %v1025_v16 = vrot.slane %v4337_v59, 1  ;;  %v5233_v38 = vld [vmem:[%s5460_s23 + $0x50] sm:$0xff]   ;;  %v1472_v39 = vrot.slane %v5232_v35, 1  ;;  %v5797_v44 = vld [vmem:[%s5460_s23 + $0xc] sm:$0xf] }
  0x4f   : > { %v547_v62 = vsel %vm415_vm1, %v542_v6, %v5502_v33  ;;  %v2119_v33 = vsel %vm618_vm0, %v5526_v54, 0  ;;  %v1474_v40 = vrot.slane %v5233_v38, 1  ;;  %v4393_v48 = vcombine.low %v1766_v43, %v5797_v44  ;;  %v5236_v52 = vld [vmem:[%s5460_s23 + $0x68] sm:$0xff]   ;;  %v5867_v43 = vld [vmem:[%s5460_s23 + $0x40] sm:$0xff]  }
  0x50   : > { %v1027_v7 = vsel %vm1024_vm3, %v1025_v16, %v1026_v61  ;;  %v1473_v57 = vsel %vm1024_vm3, %v1470_v32, %v1472_v39 }
  0x51   : > { %v1899_v59 = vshrl.u32 %v4393_v48, 16  ;;  %v1902_v6 = vshll.u32 %v4393_v48, 16 }
  0x55   : > { %4787 = vmatmul.mubr.msk.bf16.gmra.mxu0 %vm563_vm2, %v531_v51  ;;  %4821 = vmatmul.mubr.msk.bf16.gmra.mxu1 %vm563_vm2, %v5570_v24  ;;  %v5721_v24 = vld [vmem:[%s7018_s1 + $0xc] sm:$0x3]  ;;  %v5801_v51 = vld [vmem:[%s5460_s23 + $0x10] sm:$0xff]  }
  0x56   : > { %4790 = vmatprep.mubr.msk.bf16.mxu0 %vm563_vm2, %v539_v53  ;;  %4824 = vmatprep.mubr.msk.bf16.mxu1 %vm563_vm2, %v5597_v41  ;;  %v5224_v41 = vld [vmem:[%s5460_s23 + $0x8] sm:$0xfe]   ;;  %v5237_v53 = vld [vmem:[%s5460_s23 + $0x70] sm:$0xff]   ;;  %v1907_v16 = vshrl.u32 %v5801_v51, 16  ;;  %v1910_v61 = vshll.u32 %v5801_v51, 16 }
  0x57   : > { %v1457_v54 = vrot.slane %v5224_v41, 1 }
  0x58   : > { %v1909_v41 = vrot.slane %v1907_v16, 1  ;;  %v1961_v16 = vshrl.u32 %v5867_v43, 16 }
  0x5d   : > { %4791 = vmatmul.mubr.msk.bf16.gmra.mxu0 %vm563_vm2, %v547_v62  ;;  %4825 = vmatmul.mubr.msk.bf16.gmra.mxu1 %vm563_vm2, %v5605_v45  ;;  %v5225_v45 = vld [vmem:[%s5460_s23 + $0x10] sm:$0xff]   ;;  %v1482_v62 = vrot.slane %v5237_v53, 1 }
  0x5e   : > { %4838 = vmatprep.mubr.msk.bf16.mxu0 %vm563_vm2, %v1027_v7  ;;  %4828 = vmatprep.mubr.msk.bf16.mxu1 %vm563_vm2, %v5618_v55  ;;  %v1458_v20 = vrot.slane %v5225_v45, 1  ;;  %v5226_v55 = vld [vmem:[%s5460_s23 + $0x18] sm:$0xff]   ;;  %v1912_v45 = vrot.slane %v1910_v61, 2  ;;  %v1964_v61 = vshll.u32 %v5867_v43, 16 }
  0x5f   : > { %v1460_v1 = vrot.slane %v5226_v55, 1  ;;  %v5821_v7 = vld [vmem:[%s5460_s23 + $0x18] sm:$0xff]  }
  0x61   : > { %v1461_v10 = vsel %vm1024_vm3, %v1458_v20, %v1460_v1 }
  0x65   : > { %4839 = vmatmul.mubr.msk.bf16.vlgmr.msra.gmra.mxu0 %vm563_vm2, %v1029_v9  ;;  %4829 = vmatmul.mubr.msk.bf16.gmra.mxu1 %vm563_vm2, %v5621_v56  ;;  %v1901_v9 = vrot.slane %v1899_v59, 1  ;;  %v1916_v56 = vshrl.u32 %v5821_v7, 16 }
  0x66   : > { %4842 = vmatprep.mubr.msk.bf16.mxu0 %vm563_vm2, %v5575_v25  ;;  %4913 = vmatpush3.bf16.msra.mxu0 %v2119_v33  ;;  %v1459_v25 = vsel %vm1024_vm3, %v1457_v54, %v1458_v20  ;;  %v1904_v33 = vrot.slane %v1902_v6, 2  ;;  %v5238_v20 = vld [vmem:[%s5460_s23 + $0x78] sm:$0xff]  }
  0x67   : > { %5157 = vmatprep.subr.msk.bf16.mxu0 %vm618_vm0, %v5721_v24  ;;  %4832 = vmatprep.mubr.msk.bf16.mxu1 %vm563_vm2, %v5479_v17  ;;  %v5239_v17 = vld [vmem:[%s5460_s23 + $0x80] sm:$0xff]  }
  0x6d   : > { %4843 = vmatmul.mubr.msk.bf16.gmra.mxu0 %vm563_vm2, %v5586_v36  ;;  %4833 = vmatmul.mubr.msk.bf16.gmra.mxu1 %vm563_vm2, %v4318_v63  ;;  %v1463_v36 = vsel %vm1024_vm3, %v1460_v1, %v1462_v8  ;;  %v1913_v63 = vor.u32 %v1912_v45, %v1909_v41  ;;  %v1484_v1 = vrot.slane %v5238_v20, 1  ;;  %v1963_v45 = vrot.slane %v1961_v16, 1  ;;  %v5896_v20 = vld [vmem:[%s5460_s23 + $0x50] sm:$0xff]   ;;  %v5954_v16 = vld [vmem:[%s5460_s23 + $0x78] sm:$0xff]  }
  0x6e   : > { %4846 = vmatprep.mubr.msk.bf16.mxu0 %vm563_vm2, %v5591_v28  ;;  %4876 = vmatprep.mubr.msk.bf16.mxu1 %vm563_vm2, %v1459_v25  ;;  %v1464_v28 = vrot.slane %v5228_v11, 1  ;;  %v1925_v25 = vshrl.u32 %v5824_v18, 16  ;;  %v5840_v11 = vld [vmem:[%s5460_s23 + $0x28] sm:$0xff]  }
  0x6f   : > { %v1937_v32 = vshll.u32 %v5840_v11, 16 }
  0x70   : > { %v1465_v26 = vsel %vm1024_vm3, %v1462_v8, %v1464_v28  ;;  %v1918_v8 = vrot.slane %v1916_v56, 1  ;;  %v1927_v12 = vrot.slane %v1925_v25, 1  ;;  %v2343_v25 = vrot.slane %v5821_v7, 2 }
  0x75   : > { %4847 = vmatmul.mubr.msk.bf16.gmra.mxu0 %vm563_vm2, %v5600_v42  ;;  %4877 = vmatmul.mubr.msk.bf16.vlgmr.msra.gmra.mxu1 %vm563_vm2, %v1461_v10  ;;  %v1467_v42 = vsel %vm1024_vm3, %v1464_v28, %v1466_v22  ;;  %v5844_v28 = vld [vmem:[%s5460_s23 + $0x30] sm:$0xff]  }
  0x76   : > { %4850 = vmatprep.mubr.msk.bf16.mxu0 %vm563_vm2, %v5608_v46  ;;  %4880 = vmatprep.mubr.msk.bf16.mxu1 %vm563_vm2, %v1463_v36  ;;  %v5768_v46 = vld [vmem:[%s7018_s1 + $0xc] ss:$0 sps:$4 sm:$0xcc]   ;;  %v1943_v19 = vshrl.u32 %v5844_v28, 16 }
  0x77   : > { %4951 = vmatpush3.bf16.msra.mxu1 %v2436_v13  ;;  %v1930_v13 = vrot.slane %v1928_v0, 2  ;;  %v2345_v0 = vrot.slane %v5824_v18, 2 }
  0x78   : > { %v1945_v2 = vrot.slane %v1943_v19, 1 }
  0x7d   : > { %4851 = vmatmul.mubr.msk.bf16.gmra.mxu0 %vm563_vm2, %v5612_v49  ;;  %4881 = vmatmul.mubr.msk.bf16.gmra.mxu1 %vm563_vm2, %v1465_v26  ;;  %v3268_v49 = vrot.slane %v5768_v46, 2  ;;  %v5242_v26 = vld [vmem:[%s5460_s23 + $0x88] sm:$0xff]   ;;  %v2347_v46 = vrot.slane %v5840_v11, 2 }
  0x7e   : > { %4854 = vmatprep.mubr.msk.bf16.mxu0 %vm563_vm2, %v5624_v58  ;;  %4884 = vmatprep.mubr.msk.bf16.mxu1 %vm563_vm2, %v1467_v42  ;;  %v1469_v58 = vsel %vm1024_vm3, %v1466_v22, %v1468_v31  ;;  %v1485_v22 = vsel %vm1024_vm3, %v1482_v62, %v1484_v1  ;;  %v5244_v42 = vld [vmem:[%s5460_s23 + $0x90] sm:$0xff]   ;;  %v1934_v31 = vshrl.u32 %v5840_v11, 16  ;;  %v1488_v35 = vrot.slane %v5242_v26, 1 }
  0x7f   : > { %5158 = vmatprep.subr.msk.bf16.mxu1 %vm618_vm0, %v3268_v49  ;;  %v3324_v18 = vsel %vm618_vm0, %v3268_v49, 0  ;;  %v2349_v49 = vrot.slane %v5844_v28, 2 }
  0x81   : > { %v2350_v11 = vsel %vm2339_vm5, %v2347_v46, %v2349_v49 }
  0x85   : > { %4855 = vmatmul.mubr.msk.bf16.gmra.mxu0 %vm563_vm2, %v5629_v60  ;;  %4885 = vmatmul.mubr.msk.bf16.gmra.mxu1 %vm563_vm2, %v1469_v58  ;;  %v1475_v60 = vsel %vm1024_vm3, %v1472_v39, %v1474_v40  ;;  %v1931_v58 = vor.u32 %v1930_v13, %v1927_v12  ;;  %v1936_v39 = vrot.slane %v1934_v31, 1 }
  0x86   : > { %4858 = vmatprep.mubr.msk.bf16.mxu0 %vm563_vm2, %v5637_v3  ;;  %4888 = vmatprep.mubr.msk.bf16.mxu1 %vm563_vm2, %v1471_v37  ;;  %v1476_v3 = vrot.slane %v5234_v30, 1  ;;  %v1490_v37 = vrot.slane %v5244_v42, 1  ;;  %v5863_v30 = vld [vmem:[%s5460_s23 + $0x38] sm:$0xff]  }
  0x87   : > { %v1952_v59 = vshrl.u32 %v5863_v30, 16 }
  0x8d   : > { %4859 = vmatmul.mubr.msk.bf16.gmra.mxu0 %vm563_vm2, %v5642_v4  ;;  %4889 = vmatmul.mubr.msk.bf16.gmra.mxu1 %vm563_vm2, %v1473_v57  ;;  %v1477_v4 = vsel %vm1024_vm3, %v1474_v40, %v1476_v3  ;;  %v1939_v40 = vrot.slane %v1937_v32, 2  ;;  %v2334_v57 = vld [vmem:[%s5460_s23 + $0x8] sm:$0xc] }
  0x8e   : > { %4862 = vmatprep.mubr.msk.bf16.mxu0 %vm563_vm2, %v5645_v5  ;;  %4892 = vmatprep.mubr.msk.bf16.mxu1 %vm563_vm2, %v1475_v60  ;;  %v1479_v5 = vsel %vm1024_vm3, %v1476_v3, %v1478_v47 }
  0x8f   : > { %v1940_v53 = vor.u32 %v1939_v40, %v1936_v39 }
  0x95   : > { %4863 = vmatmul.mubr.msk.bf16.gmra.mxu0 %vm563_vm2, %v5653_v14  ;;  %4893 = vmatmul.mubr.msk.bf16.gmra.mxu1 %vm563_vm2, %v1477_v4  ;;  %v1480_v14 = vrot.slane %v5236_v52, 1  ;;  %v5875_v4 = vld [vmem:[%s7018_s1 + $0x10] sm:$0x3]  ;;  %v1491_v52 = vsel %vm1024_vm3, %v1488_v35, %v1490_v37 }
  0x96   : > { %4866 = vmatprep.mubr.msk.bf16.mxu0 %vm563_vm2, %v5658_v50  ;;  %4896 = vmatprep.mubr.msk.bf16.mxu1 %vm563_vm2, %v1479_v5  ;;  %v1057_v50 = vsel %vm1024_vm3, %v1054_v34, %v1056_v15  ;;  %v1919_v34 = vshll.u32 %v5821_v7, 16  ;;  %v1905_v15 = vor.u32 %v1904_v33, %v1901_v9  ;;  %v4430_v5 = vcombine.low %v2334_v57, %v5797_v44  ;;  %v5892_v33 = vld [vmem:[%s5460_s23 + $0x48] sm:$0xff]   ;;  %v5938_v57 = vld [vmem:[%s5460_s23 + $0x70] sm:$0xff]  }
  0x97   : > { %v1481_v54 = vsel %vm1024_vm3, %v1478_v47, %v1480_v14  ;;  %v1483_v55 = vsel %vm1024_vm3, %v1480_v14, %v1482_v62  ;;  %v2874_v47 = vsel %vm618_vm0, %v5721_v24, 0  ;;  %v1955_v24 = vshll.u32 %v5863_v30, 16 }
  0x98   : > { %v1921_v10 = vrot.slane %v1919_v34, 2  ;;  %v1914_v36 = vsel %vm1897_vm4, %v1905_v15, %v1913_v63  ;;  %v2340_v44 = vrot.slane %v4430_v5, 2  ;;  %v2341_v14 = vrot.slane %v5801_v51, 2 }
  0x99   : > { %v1941_v62 = vsel %vm1897_vm4, %v1931_v58, %v1940_v53  ;;  %v1957_v9 = vrot.slane %v1955_v24, 2  ;;  %v1973_v56 = vshll.u32 %v5892_v33, 16  ;;  %v1979_v15 = vshrl.u32 %v5896_v20, 16 }
  0x9a   : > { %v1922_v29 = vor.u32 %v1921_v10, %v1918_v8  ;;  %v5911_v10 = vld [vmem:[%s5460_s23 + $0x58] sm:$0xff]   ;;  %v2344_v26 = vsel %vm2339_vm5, %v2341_v14, %v2343_v25  ;;  %v2346_v7 = vsel %vm2339_vm5, %v2343_v25, %v2345_v0  ;;  %v2351_v5 = vrot.slane %v5863_v30, 2 }
  0x9b   : > { %v1975_v8 = vrot.slane %v1973_v56, 2  ;;  %v1981_v12 = vrot.slane %v1979_v15, 1  ;;  %v1988_v42 = vshrl.u32 %v5911_v10, 16 }
  0x9c   : > { %v1923_v38 = vsel %vm1897_vm4, %v1913_v63, %v1922_v29  ;;  %v1932_v60 = vsel %vm1897_vm4, %v1922_v29, %v1931_v58  ;;  %v1982_v63 = vshll.u32 %v5896_v20, 16  ;;  %v1991_v29 = vshll.u32 %v5911_v10, 16 }
  0x9d   : > { %4867 = vmatmul.mubr.msk.bf16.gmra.mxu0 %vm563_vm2, %v1057_v50  ;;  %4897 = vmatmul.mubr.msk.bf16.gmra.mxu1 %vm563_vm2, %v1481_v54  ;;  %v1954_v50 = vrot.slane %v1952_v59, 1  ;;  %v1966_v54 = vrot.slane %v1964_v61, 2 }
  0x9e   : > { %4870 = vmatprep.mubr.msk.bf16.mxu0 %vm563_vm2, %v5668_v23  ;;  %4900 = vmatprep.mubr.msk.bf16.mxu1 %vm563_vm2, %v1483_v55  ;;  %v1486_v23 = vrot.slane %v5239_v17, 1  ;;  %v2342_v55 = vsel %vm2339_vm5, %v2340_v44, %v2341_v14  ;;  %v1970_v17 = vshrl.u32 %v5892_v33, 16  ;;  %v1984_v13 = vrot.slane %v1982_v63, 2  ;;  %v5974_v63 = vld [vmem:[%s5460_s23 + $0x88] sm:$0xff]  }
  0x9f   : > { %v1958_v51 = vor.u32 %v1957_v9, %v1954_v50  ;;  %v1967_v34 = vor.u32 %v1966_v54, %v1963_v45  ;;  %v2352_v50 = vsel %vm2339_vm5, %v2349_v49, %v2351_v5  ;;  %v2024_v9 = vshrl.u32 %v5954_v16, 16 }
  0xa0   : > { %v1487_v27 = vsel %vm1024_vm3, %v1484_v1, %v1486_v23  ;;  %v1489_v48 = vsel %vm1024_vm3, %v1486_v23, %v1488_v35  ;;  %v1972_v23 = vrot.slane %v1970_v17, 1  ;;  %v1985_v31 = vor.u32 %v1984_v13, %v1981_v12 }
  0xa1   : > { %v1993_v35 = vrot.slane %v1991_v29, 2  ;;  %v2357_v17 = vrot.slane %v5896_v20, 2  ;;  %v2045_v12 = vshll.u32 %v5974_v63, 16 }
  0xa5   : > { %4871 = vmatmul.mubr.msk.bf16.gmra.mxu0 %vm563_vm2, %v1058_v21  ;;  %4901 = vmatmul.mubr.msk.bf16.gmra.mxu1 %vm563_vm2, %v1485_v22  ;;  %v1946_v21 = vshll.u32 %v5844_v28, 16  ;;  %v5915_v22 = vld [vmem:[%s5460_s23 + $0x60] sm:$0xff]  }
  0xa6   : > { %4914 = vmatprep.mubr.msk.bf16.mxu0 %vm563_vm2, %v1914_v36  ;;  %4904 = vmatprep.mubr.msk.bf16.mxu1 %vm563_vm2, %v1487_v27  ;;  %v1968_v36 = vsel %vm1897_vm4, %v1958_v51, %v1967_v34  ;;  %v1976_v27 = vor.u32 %v1975_v8, %v1972_v23  ;;  %v1997_v32 = vshrl.u32 %v5915_v22, 16  ;;  %v2000_v58 = vshll.u32 %v5915_v22, 16  ;;  %v5978_v23 = vld [vmem:[%s5460_s23 + $0x90] sm:$0xff]  }
  0xa7   : > { %v1948_v3 = vrot.slane %v1946_v21, 2  ;;  %v1990_v21 = vrot.slane %v1988_v42, 1 }
  0xa8   : > { %v1977_v19 = vsel %vm1897_vm4, %v1967_v34, %v1976_v27  ;;  %v1999_v39 = vrot.slane %v1997_v32, 1  ;;  %v2002_v40 = vrot.slane %v2000_v58, 2  ;;  %v2026_v34 = vrot.slane %v2024_v9, 1 }
  0xa9   : > { %v1949_v6 = vor.u32 %v1948_v3, %v1945_v2  ;;  %v1994_v28 = vor.u32 %v1993_v35, %v1990_v21 }
  0xab   : > { %v1950_v41 = vsel %vm1897_vm4, %v1940_v53, %v1949_v6  ;;  %v1959_v1 = vsel %vm1897_vm4, %v1949_v6, %v1958_v51  ;;  %v2353_v53 = vrot.slane %v5867_v43, 2  ;;  %v1995_v59 = vsel %vm1897_vm4, %v1985_v31, %v1994_v28 }
  0xac   : > { %v2355_v51 = vrot.slane %v5892_v33, 2 }
  0xad   : > { %4915 = vmatmul.mubr.msk.bf16.vlgmr.msra.gmra.mxu0 %vm563_vm2, %v1923_v38  ;;  %4905 = vmatmul.mubr.msk.bf16.gmra.mxu1 %vm563_vm2, %v1489_v48  ;;  %v1986_v38 = vsel %vm1897_vm4, %v1976_v27, %v1985_v31  ;;  %v2015_v48 = vshrl.u32 %v5938_v57, 16  ;;  %v2354_v30 = vsel %vm2339_vm5, %v2351_v5, %v2353_v53  ;;  %v2361_v27 = vrot.slane %v5915_v22, 2  ;;  %v5999_v22 = vld [vmem:[%s5460_s23 + $0x98] ss:$0 sps:$4 sm:$0x11]  }
  0xae   : > { %4918 = vmatprep.mubr.msk.bf16.mxu0 %vm563_vm2, %v1932_v60  ;;  %4989 = vmatpush3.bf16.msra.mxu0 %v2874_v47  ;;  %v2348_v60 = vsel %vm2339_vm5, %v2345_v0, %v2347_v46  ;;  %v2003_v47 = vor.u32 %v2002_v40, %v1999_v39  ;;  %v2356_v8 = vsel %vm2339_vm5, %v2353_v53, %v2355_v51  ;;  %v2047_v31 = vrot.slane %v2045_v12, 2  ;;  %v6006_v39 = vld [vmem:[%s5460_s23 + $0x14] sm:$0xf] }
  0xaf   : > { %5159 = vmatprep.subr.msk.bf16.mxu0 %vm618_vm0, %v5875_v4  ;;  %4908 = vmatprep.mubr.msk.bf16.mxu1 %vm563_vm2, %v1491_v52  ;;  %v2018_v52 = vshll.u32 %v5938_v57, 16  ;;  %v2017_v44 = vrot.slane %v2015_v48, 1  ;;  %v2358_v33 = vsel %vm2339_vm5, %v2355_v51, %v2357_v17  ;;  %v2365_v40 = vrot.slane %v5938_v57, 2 }
  0xb0   : > { %v2004_v61 = vsel %vm1897_vm4, %v1994_v28, %v2003_v47 }
  0xb1   : > { %v2020_v14 = vrot.slane %v2018_v52, 2 }
  0xb3   : > { %v2021_v45 = vor.u32 %v2020_v14, %v2017_v44 }
  0xb5   : > { %4919 = vmatmul.mubr.msk.bf16.gmra.mxu0 %vm563_vm2, %v1941_v62  ;;  %4909 = vmatmul.mubr.msk.bf16.gmra.mxu1 %vm563_vm2, %v1490_v37  ;;  %v5934_v37 = vld [vmem:[%s5460_s23 + $0x68] sm:$0xff]   ;;  %v5958_v62 = vld [vmem:[%s5460_s23 + $0x80] sm:$0xff]  }
  0xb6   : > { %4922 = vmatprep.mubr.msk.bf16.mxu0 %vm563_vm2, %v1950_v41  ;;  %4952 = vmatprep.mubr.msk.bf16.mxu1 %vm563_vm2, %v2342_v55  ;;  %v2006_v2 = vshrl.u32 %v5934_v37, 16  ;;  %v2009_v3 = vshll.u32 %v5934_v37, 16  ;;  %v2027_v41 = vshll.u32 %v5954_v16, 16  ;;  %v2033_v54 = vshrl.u32 %v5958_v62, 16 }
  0xb7   : > { %v2036_v55 = vshll.u32 %v5958_v62, 16  ;;  %v2363_v35 = vrot.slane %v5934_v37, 2  ;;  %v2369_v44 = vrot.slane %v5958_v62, 2 }
  0xb8   : > { %v2008_v24 = vrot.slane %v2006_v2, 1  ;;  %v2011_v6 = vrot.slane %v2009_v3, 2  ;;  %v2029_v15 = vrot.slane %v2027_v41, 2  ;;  %v2035_v0 = vrot.slane %v2033_v54, 1  ;;  %v6014_v3 = vld [vmem:[%s5460_s23 + $0x18] sm:$0xff]   ;;  %v6037_v41 = vld [vmem:[%s5460_s23 + $0x28] sm:$0xff]  }
  0xb9   : > { %v2366_v37 = vsel %vm2339_vm5, %v2363_v35, %v2365_v40 }
  0xba   : > { %v2012_v43 = vor.u32 %v2011_v6, %v2008_v24  ;;  %v2030_v20 = vor.u32 %v2029_v15, %v2026_v34  ;;  %v2367_v24 = vrot.slane %v5954_v16, 2  ;;  %v2371_v15 = vrot.slane %v5974_v63, 2 }
  0xbc   : > { %v2013_v56 = vsel %vm1897_vm4, %v2003_v47, %v2012_v43  ;;  %v2022_v25 = vsel %vm1897_vm4, %v2012_v43, %v2021_v45  ;;  %v2031_v42 = vsel %vm1897_vm4, %v2021_v45, %v2030_v20  ;;  %v2364_v47 = vsel %vm2339_vm5, %v2361_v27, %v2363_v35 }
  0xbd   : > { %4923 = vmatmul.mubr.msk.bf16.gmra.mxu0 %vm563_vm2, %v1959_v1  ;;  %4953 = vmatmul.mubr.msk.bf16.vlgmr.msra.gmra.mxu1 %vm563_vm2, %v2344_v26  ;;  %v2038_v1 = vrot.slane %v2036_v55, 2  ;;  %v2051_v26 = vshrl.u32 %v5978_v23, 16  ;;  %v2368_v45 = vsel %vm2339_vm5, %v2365_v40, %v2367_v24  ;;  %v2370_v62 = vsel %vm2339_vm5, %v2367_v24, %v2369_v44 }
  0xbe   : > { %4926 = vmatprep.mubr.msk.bf16.mxu0 %vm563_vm2, %v1968_v36  ;;  %4956 = vmatprep.mubr.msk.bf16.mxu1 %vm563_vm2, %v2346_v7  ;;  %v2042_v36 = vshrl.u32 %v5974_v63, 16  ;;  %v2054_v7 = vshll.u32 %v5978_v23, 16 }
  0xbf   : > { %5027 = vmatpush3.bf16.msra.mxu1 %v3324_v18  ;;  %v2039_v13 = vor.u32 %v2038_v1, %v2035_v0  ;;  %v2359_v18 = vrot.slane %v5911_v10, 2  ;;  %v2053_v58 = vrot.slane %v2051_v26, 1  ;;  %v6059_v26 = vld [vmem:[%s5460_s23 + $0x30] sm:$0xff]  }
  0xc0   : > { %v2044_v29 = vrot.slane %v2042_v36, 1  ;;  %v2056_v46 = vrot.slane %v2054_v7, 2  ;;  %v3107_v36 = vshll.u32 %v6014_v3, 16 }
  0xc1   : > { %v2040_v32 = vsel %vm1897_vm4, %v2030_v20, %v2039_v13  ;;  %v2360_v49 = vsel %vm2339_vm5, %v2357_v17, %v2359_v18  ;;  %v3104_v20 = vshrl.u32 %v6014_v3, 16 }
  0xc2   : > { %v2048_v10 = vor.u32 %v2047_v31, %v2044_v29  ;;  %v2057_v21 = vor.u32 %v2056_v46, %v2053_v58  ;;  %v2372_v29 = vsel %vm2339_vm5, %v2369_v44, %v2371_v15 }
  0xc4   : > { %v2058_v28 = vsel %vm1897_vm4, %v2048_v10, %v2057_v21 }
  0xc5   : > { %4927 = vmatmul.mubr.msk.bf16.gmra.mxu0 %vm563_vm2, %v1977_v19  ;;  %4957 = vmatmul.mubr.msk.bf16.gmra.mxu1 %vm563_vm2, %v2348_v60  ;;  %v2362_v19 = vsel %vm2339_vm5, %v2359_v18, %v2361_v27  ;;  %v2049_v60 = vsel %vm1897_vm4, %v2039_v13, %v2048_v10  ;;  %v6063_v27 = vld [vmem:[%s5460_s23 + $0x38] sm:$0xff]   ;;  %v3109_v10 = vrot.slane %v3107_v36, 3 }
  0xc6   : > { %4930 = vmatprep.mubr.msk.bf16.mxu0 %vm563_vm2, %v1986_v38  ;;  %4960 = vmatprep.mubr.msk.bf16.mxu1 %vm563_vm2, %v2350_v11  ;;  %v2651_v38 = vld [vmem:[%s5460_s23 + $0x10] sm:$0xc]  ;;  %v2060_v11 = vshll.u32 %v5999_v22, 16  ;;  %v2791_v40 = vrot.slane %v6063_v27, 2 }
  0xc7   : > { %v4450_v2 = vcombine.low %v2651_v38, %v6006_v39 }
  0xc8   : > { %v2062_v57 = vrot.slane %v2060_v11, 2  ;;  %v2375_v11 = vrot.slane %v5999_v22, 2 }
  0xc9   : > { %v2782_v53 = vrot.slane %v4450_v2, 2 }
  0xca   : > { %v2063_v14 = vsel %vm1897_vm4, %v2057_v21, %v2062_v57 }
  0xcd   : > { %4931 = vmatmul.mubr.msk.bf16.gmra.mxu0 %vm563_vm2, %v1995_v59  ;;  %4961 = vmatmul.mubr.msk.bf16.gmra.mxu1 %vm563_vm2, %v2352_v50  ;;  %v2783_v59 = vrot.slane %v6014_v3, 2  ;;  %v6031_v50 = vld [vmem:[%s5460_s23 + $0x20] sm:$0xff]  }
  0xce   : > { %4934 = vmatprep.mubr.msk.bf16.mxu0 %vm563_vm2, %v2004_v61  ;;  %4964 = vmatprep.mubr.msk.bf16.mxu1 %vm563_vm2, %v2354_v30  ;;  %v2785_v55 = vrot.slane %v6031_v50, 2 }
  0xcf   : > { %v2784_v9 = vsel %vm2339_vm5, %v2782_v53, %v2783_v59  ;;  %v3125_v53 = vshll.u32 %v6037_v41, 16 }
  0xd0   : > { %v2786_v13 = vsel %vm2339_vm5, %v2783_v59, %v2785_v55 }
  0xd5   : > { %4935 = vmatmul.mubr.msk.bf16.gmra.mxu0 %vm563_vm2, %v2013_v56  ;;  %4965 = vmatmul.mubr.msk.bf16.gmra.mxu1 %vm563_vm2, %v2356_v8  ;;  %v2787_v56 = vrot.slane %v6037_v41, 2  ;;  %v3096_v8 = vshrl.u32 %v4450_v2, 16 }
  0xd6   : > { %4938 = vmatprep.mubr.msk.bf16.mxu0 %vm563_vm2, %v2022_v25  ;;  %4968 = vmatprep.mubr.msk.bf16.mxu1 %vm563_vm2, %v2358_v33  ;;  %v2373_v25 = vrot.slane %v5978_v23, 2  ;;  %v3099_v33 = vshll.u32 %v4450_v2, 16  ;;  %v3637_v23 = vsel %vm618_vm0, %v5875_v4, 0  ;;  %v2789_v4 = vrot.slane %v6059_v26, 2 }
  0xd7   : > { %v2788_v63 = vsel %vm2339_vm5, %v2785_v55, %v2787_v56  ;;  %v3098_v46 = vrot.slane %v3096_v8, 2  ;;  %v3116_v2 = vshll.u32 %v6031_v50, 16 }
  0xd8   : > { %v2374_v31 = vsel %vm2339_vm5, %v2371_v15, %v2373_v25  ;;  %v2790_v24 = vsel %vm2339_vm5, %v2787_v56, %v2789_v4  ;;  %v3127_v15 = vrot.slane %v3125_v53, 3 }
  0xdd   : > { %4939 = vmatmul.mubr.msk.bf16.gmra.mxu0 %vm563_vm2, %v2031_v42  ;;  %4969 = vmatmul.mubr.msk.bf16.gmra.mxu1 %vm563_vm2, %v2360_v49  ;;  %v3101_v49 = vrot.slane %v3099_v33, 3 }
  0xde   : > { %4942 = vmatprep.mubr.msk.bf16.mxu0 %vm563_vm2, %v2040_v32  ;;  %4972 = vmatprep.mubr.msk.bf16.mxu1 %vm563_vm2, %v2362_v19  ;;  %v3106_v19 = vrot.slane %v3104_v20, 2 }
  0xe0   : > { %v3110_v57 = vor.u32 %v3109_v10, %v3106_v19 }
  0xe5   : > { %v4764_v48 = vpop.f32.mrf.mxu0  ;;  %4943 = vmatmul.mubr.msk.bf16.gmra.mxu0 %vm563_vm2, %v2049_v60  ;;  %v6020_v52 = vpop.f32.mrf.mxu1  ;;  %4973 = vmatmul.mubr.msk.bf16.gmra.mxu1 %vm563_vm2, %v2364_v47 }
  0xe6   : > { %4946 = vmatprep.mubr.msk.bf16.mxu0 %vm563_vm2, %v2058_v28  ;;  %7033 = vst [vmem:[#allocation5_spill] sm:$0xff] %v6020_v52  ;;  %4976 = vmatprep.mubr.msk.bf16.mxu1 %vm563_vm2, %v2366_v37  ;;  %v3113_v28 = vshrl.u32 %v6031_v50, 16  ;;  %v3102_v37 = vor.u32 %v3101_v49, %v3098_v46  ;;  %v6118_v46 = vld [vmem:[%s5460_s23 + $0x50] sm:$0xff]  }
  0xe7   : > { %v656_v5 = vpop.f32.mrf.mxu0  ;;  %v6026_v6 = vpop.f32.mrf.mxu1 }
  0xe8   : > { %7034 = vst [vmem:[#allocation6_spill] sm:$0xff] %v6026_v6 }
  0xe9   : > { %v4765_v61 = vpop.f32.mrf.mxu0  ;;  %v6033_v30 = vpop.f32.mrf.mxu1 }
  0xea   : > { %7035 = vst [vmem:[#allocation7_spill] sm:$0xff] %v6033_v30 }
  0xeb   : > { %v659_v43 = vpop.f32.mrf.mxu0  ;;  %v6040_v54 = vpop.f32.mrf.mxu1 }
  0xec   : > { %7036 = vst [vmem:[#allocation8_spill] sm:$0xff] %v6040_v54 }
  0xed   : > { %v4768_v16 = vpop.f32.mrf.mxu0  ;;  %4947 = vmatmul.mubr.msk.bf16.gmra.mxu0 %vm563_vm2, %v2063_v14  ;;  %v4802_v51 = vpop.f32.mrf.mxu1  ;;  %4977 = vmatmul.mubr.msk.bf16.gmra.mxu1 %vm563_vm2, %v2368_v45  ;;  %v2792_v14 = vsel %vm2339_vm5, %v2789_v4, %v2791_v40  ;;  %v2376_v45 = vsel %vm2339_vm5, %v2373_v25, %v2375_v11  ;;  %v6122_v4 = vld [vmem:[%s5460_s23 + $0x58] sm:$0xff]  }
  0xee   : > { %4990 = vmatprep.mubr.msk.bf16.mxu0 %vm563_vm2, %v2784_v9  ;;  %v6048_v34 = vadd.f32 %v4802_v51, %v4764_v48  ;;  %4980 = vmatprep.mubr.msk.bf16.mxu1 %vm563_vm2, %v2370_v62  ;;  %v3118_v62 = vrot.slane %v3116_v2, 3 }
  0xef   : > { %v672_v17 = vpop.f32.mrf.mxu0  ;;  %v876_v0 = vpop.f32.mrf.mxu1 }
  0xf0   : > { %v6055_v12 = vadd.f32 %v876_v0, %v656_v5  ;;  %v3122_v5 = vshrl.u32 %v6037_v41, 16 }
  0xf1   : > { %v4769_v1 = vpop.f32.mrf.mxu0  ;;  %v4803_v7 = vpop.f32.mrf.mxu1 }
  0xf2   : > { %v6067_v42 = vadd.f32 %v4803_v7, %v4765_v61  ;;  %v6090_v61 = vld [vmem:[%s5460_s23 + $0x40] sm:$0xff]   ;;  %v3124_v56 = vrot.slane %v3122_v5, 2  ;;  %v3134_v7 = vshll.u32 %v6059_v26, 16 }
  0xf3   : > { %v675_v18 = vpop.f32.mrf.mxu0  ;;  %v879_v32 = vpop.f32.mrf.mxu1  ;;  %v2793_v8 = vrot.slane %v6090_v61, 2 }
  0xf4   : > { %v6072_v21 = vadd.f32 %v879_v32, %v659_v43  ;;  %v6094_v43 = vld [vmem:[%s5460_s23 + $0x48] sm:$0xff]   ;;  %v3136_v2 = vrot.slane %v3134_v7, 3 }
  0xf5   : > { %v4772_v58 = vpop.f32.mrf.mxu0  ;;  %4991 = vmatmul.mubr.msk.bf16.vlgmr.msra.gmra.mxu0 %vm563_vm2, %v2786_v13  ;;  %v4806_v35 = vpop.f32.mrf.mxu1  ;;  %4981 = vmatmul.mubr.msk.bf16.gmra.mxu1 %vm563_vm2, %v2372_v29  ;;  %v2795_v33 = vrot.slane %v6094_v43, 2  ;;  %v3131_v13 = vshrl.u32 %v6059_v26, 16  ;;  %v3140_v29 = vshrl.u32 %v6063_v27, 16 }
  0xf6   : > { %4994 = vmatprep.mubr.msk.bf16.mxu0 %vm563_vm2, %v2788_v63  ;;  %5065 = vmatpush3.bf16.msra.mxu0 %v3637_v23  ;;  %v6078_v60 = vadd.f32 %v4806_v35, %v4768_v16  ;;  %v3115_v16 = vrot.slane %v3113_v28, 2  ;;  %v3128_v23 = vor.u32 %v3127_v15, %v3124_v56  ;;  %v3158_v56 = vshrl.u32 %v6094_v43, 16 }
  0xf7   : > { %v688_v38 = vpop.f32.mrf.mxu0  ;;  %4984 = vmatprep.mubr.msk.bf16.mxu1 %vm563_vm2, %v2374_v31  ;;  %v892_v47 = vpop.f32.mrf.mxu1  ;;  %v3143_v31 = vshll.u32 %v6063_v27, 16  ;;  %v2796_v10 = vsel %vm2339_vm5, %v2793_v8, %v2795_v33  ;;  %v3133_v28 = vrot.slane %v3131_v13, 2  ;;  %v3161_v15 = vshll.u32 %v6094_v43, 16 }
  0xf8   : > { %v6086_v59 = vadd.f32 %v892_v47, %v672_v17  ;;  %v3111_v17 = vsel %vm3094_vm6, %v3102_v37, %v3110_v57  ;;  %v3119_v36 = vor.u32 %v3118_v62, %v3115_v16  ;;  %v3152_v16 = vshll.u32 %v6090_v61, 16 }
  0xf9   : > { %v4773_v48 = vpop.f32.mrf.mxu0  ;;  %v4807_v22 = vpop.f32.mrf.mxu1  ;;  %v3145_v5 = vrot.slane %v3143_v31, 3 }
  0xfa   : > { %v6096_v9 = vadd.f32 %v4807_v22, %v4769_v1  ;;  %v3120_v11 = vsel %vm3094_vm6, %v3110_v57, %v3119_v36  ;;  %v2799_v22 = vrot.slane %v6122_v4, 2 }
  0xfb   : > { %v691_v44 = vpop.f32.mrf.mxu0  ;;  %v895_v55 = vpop.f32.mrf.mxu1 }
  0xfc   : > { %v6101_v0 = vadd.f32 %v895_v55, %v675_v18 }
  0xfd   : > { %v4776_v51 = vpop.f32.mrf.mxu0  ;;  %4995 = vmatmul.mubr.msk.bf16.gmra.mxu0 %vm563_vm2, %v2790_v24  ;;  %v4810_v1 = vpop.f32.mrf.mxu1  ;;  %4985 = vmatmul.mubr.msk.bf16.gmra.mxu1 %vm563_vm2, %v2376_v45  ;;  %v2797_v24 = vrot.slane %v6118_v46, 2  ;;  %v3137_v45 = vor.u32 %v3136_v2, %v3133_v28  ;;  %v3163_v28 = vrot.slane %v3161_v15, 3  ;;  %v6174_v15 = vld [vmem:[%s5460_s23 + $0x70] sm:$0xff]  }
  0xfe   : > { %4998 = vmatprep.mubr.msk.bf16.mxu0 %vm563_vm2, %v2792_v14  ;;  %v6107_v20 = vadd.f32 %v4810_v1, %v4772_v58  ;;  %5028 = vmatprep.mubr.msk.bf16.mxu1 %vm563_vm2, %v3111_v17  ;;  %v2794_v58 = vsel %vm2339_vm5, %v2791_v40, %v2793_v8  ;;  %v3142_v40 = vrot.slane %v3140_v29, 2  ;;  %v6146_v1 = vld [vmem:[%s5460_s23 + $0x60] sm:$0xff]   ;;  %7039 = vst [vmem:[#allocation11_spill] sm:$0xff] %v6174_v15 }
  0xff   : > { %v704_v25 = vpop.f32.mrf.mxu0  ;;  %v908_v18 = vpop.f32.mrf.mxu1  ;;  %7037 = vst [vmem:[#allocation9_spill] sm:$0xff] %v6146_v1  ;;  %v2800_v7 = vsel %vm2339_vm5, %v2797_v24, %v2799_v22  ;;  %v3138_v31 = vsel %vm3094_vm6, %v3128_v23, %v3137_v45 }
 0x100   : > { %v6114_v32 = vadd.f32 %v908_v18, %v688_v38  ;;  %v3129_v38 = vsel %vm3094_vm6, %v3119_v36, %v3128_v23  ;;  %v3146_v17 = vor.u32 %v3145_v5, %v3142_v40  ;;  %v6150_v18 = vld [vmem:[%s5460_s23 + $0x68] sm:$0xff]  }
 0x101   : > { %v4777_v63 = vpop.f32.mrf.mxu0  ;;  %v4811_v49 = vpop.f32.mrf.mxu1  ;;  %7038 = vst [vmem:[#allocation10_spill] sm:$0xff] %v6150_v18 }
 0x102   : > { %v6124_v35 = vadd.f32 %v4811_v49, %v4773_v48  ;;  %v3154_v49 = vrot.slane %v3152_v16, 3  ;;  %v3176_v16 = vshrl.u32 %v6122_v4, 16 }
 0x103   : > { %v707_v19 = vpop.f32.mrf.mxu0  ;;  %v911_v47 = vpop.f32.mrf.mxu1 }
 0x104   : > { %v6129_v53 = vadd.f32 %v911_v47, %v691_v44  ;;  %v3149_v44 = vshrl.u32 %v6090_v61, 16  ;;  %v2801_v47 = vrot.slane %v6146_v1, 2 }
 0x105   : > { %v4780_v37 = vpop.f32.mrf.mxu0  ;;  %4999 = vmatmul.mubr.msk.bf16.gmra.mxu0 %vm563_vm2, %v2794_v58  ;;  %v4814_v48 = vpop.f32.mrf.mxu1  ;;  %5029 = vmatmul.mubr.msk.bf16.vlgmr.msra.gmra.mxu1 %vm563_vm2, %v3120_v11 }
 0x106   : > { %5002 = vmatprep.mubr.msk.bf16.mxu0 %vm563_vm2, %v2796_v10  ;;  %v6135_v14 = vadd.f32 %v4814_v48, %v4776_v51  ;;  %5032 = vmatprep.mubr.msk.bf16.mxu1 %vm563_vm2, %v3129_v38  ;;  %v2798_v51 = vsel %vm2339_vm5, %v2795_v33, %v2797_v24  ;;  %v3151_v58 = vrot.slane %v3149_v44, 2  ;;  %v3160_v33 = vrot.slane %v3158_v56, 2 }
 0x107   : > { %v720_v57 = vpop.f32.mrf.mxu0  ;;  %v924_v62 = vpop.f32.mrf.mxu1  ;;  %v2803_v38 = vrot.slane %v6150_v18, 2  ;;  %v3170_v24 = vshll.u32 %v6118_v46, 16 }
 0x108   : > { %v6142_v8 = vadd.f32 %v924_v62, %v704_v25  ;;  %v3147_v25 = vsel %vm3094_vm6, %v3137_v45, %v3146_v17  ;;  %v3155_v5 = vor.u32 %v3154_v49, %v3151_v58  ;;  %v3164_v44 = vor.u32 %v3163_v28, %v3160_v33 }
 0x109   : > { %v4781_v55 = vpop.f32.mrf.mxu0  ;;  %v4815_v36 = vpop.f32.mrf.mxu1  ;;  %v3179_v62 = vshll.u32 %v6122_v4, 16 }
 0x10a   : > { %v6152_v29 = vadd.f32 %v4815_v36, %v4777_v63  ;;  %v3156_v49 = vsel %vm3094_vm6, %v3146_v17, %v3155_v5 }
 0x10b   : > { %v723_v13 = vpop.f32.mrf.mxu0  ;;  %v927_v10 = vpop.f32.mrf.mxu1 }
 0x10c   : > { %v6157_v2 = vadd.f32 %v927_v10, %v707_v19  ;;  %v3167_v19 = vshrl.u32 %v6118_v46, 16 }
 0x10d   : > { %v4784_v11 = vpop.f32.mrf.mxu0  ;;  %5003 = vmatmul.mubr.msk.bf16.gmra.mxu0 %vm563_vm2, %v2798_v51  ;;  %v4818_v63 = vpop.f32.mrf.mxu1  ;;  %5033 = vmatmul.mubr.msk.bf16.gmra.mxu1 %vm563_vm2, %v3138_v31  ;;  %v6178_v31 = vld [vmem:[%s5460_s23 + $0x78] sm:$0xff]  }
 0x10e   : > { %5006 = vmatprep.mubr.msk.bf16.mxu0 %vm563_vm2, %v2800_v7  ;;  %v6163_v40 = vadd.f32 %v4818_v63, %v4780_v37  ;;  %5036 = vmatprep.mubr.msk.bf16.mxu1 %vm563_vm2, %v3147_v25  ;;  %v2802_v37 = vsel %vm2339_vm5, %v2799_v22, %v2801_v47  ;;  %v2804_v7 = vsel %vm2339_vm5, %v2801_v47, %v2803_v38  ;;  %v3169_v10 = vrot.slane %v3167_v19, 2 }
 0x10f   : > { %v736_v23 = vpop.f32.mrf.mxu0  ;;  %v940_v48 = vpop.f32.mrf.mxu1  ;;  %7040 = vst [vmem:[#allocation12_spill] sm:$0xff] %v6178_v31  ;;  %v3172_v25 = vrot.slane %v3170_v24, 3  ;;  %v3178_v22 = vrot.slane %v3176_v16, 2  ;;  %v3181_v63 = vrot.slane %v3179_v62, 3  ;;  %v2805_v47 = vrot.slane %v6174_v15, 2 }
 0x110   : > { %v6170_v56 = vadd.f32 %v940_v48, %v720_v57  ;;  %v3165_v57 = vsel %vm3094_vm6, %v3155_v5, %v3164_v44  ;;  %v2807_v19 = vrot.slane %v6178_v31, 2  ;;  %v3188_v16 = vshll.u32 %v6146_v1, 16 }
 0x111   : > { %v4785_v45 = vpop.f32.mrf.mxu0  ;;  %v4819_v51 = vpop.f32.mrf.mxu1  ;;  %v3173_v5 = vor.u32 %v3172_v25, %v3169_v10  ;;  %v6206_v25 = vld [vmem:[%s5460_s23 + $0x88] sm:$0xff]  }
 0x112   : > { %v6180_v58 = vadd.f32 %v4819_v51, %v4781_v55  ;;  %v3182_v51 = vor.u32 %v3181_v63, %v3178_v22  ;;  %v2808_v10 = vsel %vm2339_vm5, %v2805_v47, %v2807_v19  ;;  %7042 = vst [vmem:[#allocation14_spill] sm:$0xff] %v6206_v25  ;;  %v3190_v30 = vrot.slane %v3188_v16, 3 }
 0x113   : > { %v739_v36 = vpop.f32.mrf.mxu0  ;;  %v943_v33 = vpop.f32.mrf.mxu1  ;;  %v3174_v22 = vsel %vm3094_vm6, %v3164_v44, %v3173_v5  ;;  %v2811_v44 = vrot.slane %v6206_v25, 2  ;;  %v3206_v16 = vshll.u32 %v6174_v15, 16 }
 0x114   : > { %v6185_v48 = vadd.f32 %v943_v33, %v723_v13  ;;  %v3185_v13 = vshrl.u32 %v6146_v1, 16 }
 0x115   : > { %v4788_v28 = vpop.f32.mrf.mxu0  ;;  %5007 = vmatmul.mubr.msk.bf16.gmra.mxu0 %vm563_vm2, %v2802_v37  ;;  %v4822_v55 = vpop.f32.mrf.mxu1  ;;  %5037 = vmatmul.mubr.msk.bf16.gmra.mxu1 %vm563_vm2, %v3156_v49  ;;  %v3197_v49 = vshll.u32 %v6150_v18, 16 }
 0x116   : > { %5010 = vmatprep.mubr.msk.bf16.mxu0 %vm563_vm2, %v2804_v7  ;;  %v6191_v24 = vadd.f32 %v4822_v55, %v4784_v11  ;;  %5040 = vmatprep.mubr.msk.bf16.mxu1 %vm563_vm2, %v3165_v57  ;;  %v3194_v7 = vshrl.u32 %v6150_v18, 16  ;;  %v2806_v11 = vsel %vm2339_vm5, %v2803_v38, %v2805_v47  ;;  %v6202_v55 = vld [vmem:[%s5460_s23 + $0x80] sm:$0xff]   ;;  %v3187_v63 = vrot.slane %v3185_v13, 2 }
 0x117   : > { %v752_v17 = vpop.f32.mrf.mxu0  ;;  %v956_v62 = vpop.f32.mrf.mxu1  ;;  %7041 = vst [vmem:[#allocation13_spill] sm:$0xff] %v6202_v55  ;;  %v2809_v47 = vrot.slane %v6202_v55, 2  ;;  %v3203_v13 = vshrl.u32 %v6174_v15, 16 }
 0x118   : > { %v6198_v33 = vadd.f32 %v956_v62, %v736_v23  ;;  %v3183_v23 = vsel %vm3094_vm6, %v3173_v5, %v3182_v51  ;;  %v3196_v38 = vrot.slane %v3194_v7, 2  ;;  %v3199_v62 = vrot.slane %v3197_v49, 3 }
 0x119   : > { %v4789_v37 = vpop.f32.mrf.mxu0  ;;  %v4823_v54 = vpop.f32.mrf.mxu1 }
 0x11a   : > { %v6208_v6 = vadd.f32 %v4823_v54, %v4785_v45  ;;  %v3200_v49 = vor.u32 %v3199_v62, %v3196_v38 }
 0x11b   : > { %v755_v57 = vpop.f32.mrf.mxu0  ;;  %v959_v52 = vpop.f32.mrf.mxu1 }
 0x11c   : > { %7043 = vst [vmem:[#allocation15_spill] sm:$0xff] %v6208_v6  ;;  %v6213_v1 = vadd.f32 %v959_v52, %v739_v36  ;;  %v3191_v52 = vor.u32 %v3190_v30, %v3187_v63  ;;  %v6230_v6 = vld [vmem:[%s5460_s23 + $0x90] sm:$0xff]   ;;  %v6234_v30 = vld [vmem:[%s5460_s23 + $0x98] sm:$0xff]  }
 0x11d   : > { %v4792_v18 = vpop.f32.mrf.mxu0  ;;  %5011 = vmatmul.mubr.msk.bf16.gmra.mxu0 %vm563_vm2, %v2806_v11  ;;  %v4826_v54 = vpop.f32.mrf.mxu1  ;;  %5041 = vmatmul.mubr.msk.bf16.gmra.mxu1 %vm563_vm2, %v3174_v22  ;;  %v3212_v11 = vshrl.u32 %v6178_v31, 16 }
 0x11e   : > { %7044 = vst [vmem:[#allocation16_spill] sm:$0xff] %v6213_v1  ;;  %5014 = vmatprep.mubr.msk.bf16.mxu0 %vm563_vm2, %v2808_v10  ;;  %v6221_v5 = vadd.f32 %v4826_v54, %v4788_v28  ;;  %5044 = vmatprep.mubr.msk.bf16.mxu1 %vm563_vm2, %v3183_v23  ;;  %v3215_v10 = vshll.u32 %v6178_v31, 16  ;;  %v2810_v1 = vsel %vm2339_vm5, %v2807_v19, %v2809_v47  ;;  %v3208_v23 = vrot.slane %v3206_v16, 3 }
 0x11f   : > { %v768_v45 = vpop.f32.mrf.mxu0  ;;  %v972_v36 = vpop.f32.mrf.mxu1  ;;  %v2812_v54 = vsel %vm2339_vm5, %v2809_v47, %v2811_v44  ;;  %v3192_v38 = vsel %vm3094_vm6, %v3182_v51, %v3191_v52  ;;  %v3214_v19 = vrot.slane %v3212_v11, 2 }
 0x120   : > { %7045 = vst [vmem:[#allocation17_spill] sm:$0xff] %v6221_v5  ;;  %v6226_v22 = vadd.f32 %v972_v36, %v752_v17  ;;  %v3205_v5 = vrot.slane %v3203_v13, 2  ;;  %v3201_v17 = vsel %vm3094_vm6, %v3191_v52, %v3200_v49  ;;  %v3217_v36 = vrot.slane %v3215_v10, 3  ;;  %v3539_v52 = vld [vmem:[%s5460_s23 + $0x10] sm:$0x8] }
 0x121   : > { %v4793_v7 = vpop.f32.mrf.mxu0  ;;  %v4827_v15 = vpop.f32.mrf.mxu1 }
 0x122   : > { %7046 = vst [vmem:[#allocation18_spill] sm:$0xff] %v6226_v22  ;;  %v6236_v63 = vadd.f32 %v4827_v15, %v4789_v37  ;;  %v2813_v15 = vrot.slane %v6230_v6, 2  ;;  %v3209_v13 = vor.u32 %v3208_v23, %v3205_v5  ;;  %v3230_v5 = vshrl.u32 %v6206_v25, 16 }
 0x123   : > { %v771_v28 = vpop.f32.mrf.mxu0  ;;  %v975_v62 = vpop.f32.mrf.mxu1  ;;  %v3233_v23 = vshll.u32 %v6206_v25, 16 }
 0x124   : > { %v6241_v22 = vadd.f32 %v975_v62, %v755_v57  ;;  %v5282_v62 = vld [vmem:[%s5460_s23 + $0xa0] ss:$0 sps:$4 sm:$0x11]  }
 0x125   : > { %v4840_v31 = vpop.f32.mrf.mxu0  ;;  %5015 = vmatmul.mubr.msk.bf16.gmra.mxu0 %vm563_vm2, %v2810_v1  ;;  %v4830_v37 = vpop.f32.mrf.mxu1  ;;  %5045 = vmatmul.mubr.msk.bf16.gmra.mxu1 %vm563_vm2, %v3192_v38  ;;  %v2815_v1 = vrot.slane %v6234_v30, 2 }
 0x126   : > { %v6244_v47 = vadd.f32 %v4840_v31, %v6048_v34  ;;  %5018 = vmatprep.mubr.msk.bf16.mxu0 %vm563_vm2, %v2812_v54  ;;  %v6250_v16 = vadd.f32 %v4830_v37, %v4792_v18  ;;  %5048 = vmatprep.mubr.msk.bf16.mxu1 %vm563_vm2, %v3201_v17  ;;  %v3221_v34 = vshrl.u32 %v6202_v55, 16  ;;  %v3224_v31 = vshll.u32 %v6202_v55, 16 }
 0x127   : > { %v1151_v51 = vpop.f32.mrf.mxu0  ;;  %v988_v11 = vpop.f32.mrf.mxu1  ;;  %v3218_v54 = vor.u32 %v3217_v36, %v3214_v19  ;;  %v4507_v19 = vcombine.low %v3539_v52, %v6006_v39  ;;  %v3232_v55 = vrot.slane %v3230_v5, 2  ;;  %v2817_v39 = vrot.slane %v5282_v62, 2 }
 0x128   : > { %v6253_v57 = vadd.f32 %v1151_v51, %v6055_v12  ;;  %v6261_v38 = vadd.f32 %v988_v11, %v768_v45  ;;  %v2814_v12 = vsel %vm2339_vm5, %v2811_v44, %v2813_v15  ;;  %v3210_v51 = vsel %vm3094_vm6, %v3200_v49, %v3209_v13 }
 0x129   : > { %v4841_v10 = vpop.f32.mrf.mxu0  ;;  %v4831_v17 = vpop.f32.mrf.mxu1  ;;  %v3223_v45 = vrot.slane %v3221_v34, 2  ;;  %v3226_v11 = vrot.slane %v3224_v31, 3  ;;  %v3219_v44 = vsel %vm3094_vm6, %v3209_v13, %v3218_v54  ;;  %v3545_v34 = vrot.slane %v4507_v19, 3 }
 0x12a   : > { %7047 = vst [vmem:[#allocation19_spill] sm:$0xff] %v6253_v57  ;;  %7048 = vst [vmem:[#allocation20_spill] sm:$0xff] %v6261_v38  ;;  %v6264_v18 = vadd.f32 %v4841_v10, %v6067_v42  ;;  %v2816_v57 = vsel %vm2339_vm5, %v2813_v15, %v2815_v1  ;;  %v6271_v36 = vadd.f32 %v4831_v17, %v4793_v7  ;;  %v3235_v38 = vrot.slane %v3233_v23, 3 }
 0x12b   : > { %v1154_v37 = vpop.f32.mrf.mxu0  ;;  %v991_v42 = vpop.f32.mrf.mxu1  ;;  %v3546_v31 = vrot.slane %v6014_v3, 3  ;;  %v3239_v13 = vshrl.u32 %v6230_v6, 16  ;;  %v3242_v52 = vshll.u32 %v6230_v6, 16  ;;  %v3251_v3 = vshll.u32 %v6234_v30, 16 }
 0x12c   : > { %v6274_v25 = vadd.f32 %v1154_v37, %v6072_v21  ;;  %v6278_v49 = vadd.f32 %v991_v42, %v771_v28  ;;  %v3236_v23 = vor.u32 %v3235_v38, %v3232_v55  ;;  %v2818_v17 = vsel %vm2339_vm5, %v2815_v1, %v2817_v39  ;;  %v6310_v38 = vld [vmem:[%s5460_s23 + $0xa0] ss:$0 sps:$4 sm:$0x33]  }
 0x12d   : > { %v4844_v10 = vpop.f32.mrf.mxu0  ;;  %5019 = vmatmul.mubr.msk.bf16.gmra.mxu0 %vm563_vm2, %v2814_v12  ;;  %v6284_v21 = vpop.f32.mrf.mxu1  ;;  %5049 = vmatmul.mubr.msk.bf16.gmra.mxu1 %vm563_vm2, %v3210_v51  ;;  %v3248_v12 = vshrl.u32 %v6234_v30, 16  ;;  %v3547_v51 = vsel %vm3544_vm7, %v3545_v34, %v3546_v31  ;;  %v3241_v19 = vrot.slane %v3239_v13, 2  ;;  %v3550_v13 = vrot.slane %v6037_v41, 3 }
 0x12e   : > { %v6281_v15 = vadd.f32 %v4844_v10, %v6078_v60  ;;  %5022 = vmatprep.mubr.msk.bf16.mxu0 %vm563_vm2, %v2816_v57  ;;  %5052 = vmatprep.mubr.msk.bf16.mxu1 %vm563_vm2, %v3219_v44  ;;  %v3227_v60 = vor.u32 %v3226_v11, %v3223_v45  ;;  %v3244_v45 = vrot.slane %v3242_v52, 3  ;;  %v3253_v44 = vrot.slane %v3251_v3, 3 }
 0x12f   : > { %v1167_v7 = vpop.f32.mrf.mxu0  ;;  %v6294_v57 = vpop.f32.mrf.mxu1  ;;  %v3250_v10 = vrot.slane %v3248_v12, 2 }
 0x130   : > { %v6291_v28 = vadd.f32 %v1167_v7, %v6086_v59  ;;  %v3228_v55 = vsel %vm3094_vm6, %v3218_v54, %v3227_v60  ;;  %v3237_v1 = vsel %vm3094_vm6, %v3227_v60, %v3236_v23  ;;  %v3245_v34 = vor.u32 %v3244_v45, %v3241_v19 }
 0x131   : > { %v4845_v5 = vpop.f32.mrf.mxu0  ;;  %v6302_v59 = vpop.f32.mrf.mxu1  ;;  %v3254_v3 = vor.u32 %v3253_v44, %v3250_v10  ;;  %v3554_v44 = vrot.slane %v6063_v27, 3 }
 0x132   : > { %v6299_v62 = vadd.f32 %v4845_v5, %v6096_v9  ;;  %v3260_v5 = vshll.u32 %v6310_v38, 16 }
 0x133   : > { %v1170_v37 = vpop.f32.mrf.mxu0  ;;  %v6312_v42 = vpop.f32.mrf.mxu1 }
 0x134   : > { %v6306_v11 = vadd.f32 %v1170_v37, %v6101_v0  ;;  %v3548_v0 = vrot.slane %v6031_v50, 3 }
 0x135   : > { %v4848_v9 = vpop.f32.mrf.mxu0  ;;  %5023 = vmatmul.mubr.msk.bf16.gmra.mxu0 %vm563_vm2, %v2818_v17  ;;  %v4878_v7 = vpop.f32.mrf.mxu1  ;;  %5053 = vmatmul.mubr.msk.bf16.gmra.mxu1 %vm563_vm2, %v3228_v55 }
 0x136   : > { %v6317_v39 = vadd.f32 %v4848_v9, %v6107_v20  ;;  %5066 = vmatprep.mubr.msk.bf16.mxu0 %vm563_vm2, %v3547_v51  ;;  %v6324_v52 = vadd.f32 %v4878_v7, %v6244_v47  ;;  %5056 = vmatprep.mubr.msk.bf16.mxu1 %vm563_vm2, %v3237_v1  ;;  %v3257_v20 = vshrl.u32 %v6310_v38, 16  ;;  %v3549_v37 = vsel %vm3544_vm7, %v3546_v31, %v3548_v0 }
 0x137   : > { %v1183_v54 = vpop.f32.mrf.mxu0  ;;  %v6330_v12 = vpop.f32.mrf.mxu1  ;;  %v3246_v47 = vsel %vm3094_vm6, %v3236_v23, %v3245_v34  ;;  %v3262_v9 = vrot.slane %v3260_v5, 3 }
 0x138   : > { %v1302_v60 = vadd.f32 %v1183_v54, %v6114_v32  ;;  %v3551_v32 = vsel %vm3544_vm7, %v3548_v0, %v3550_v13  ;;  %v3259_v55 = vrot.slane %v3257_v20, 2 }
 0x139   : > { %v4849_v50 = vpop.f32.mrf.mxu0  ;;  %v4879_v41 = vpop.f32.mrf.mxu1 }
 0x13a   : > { %v1305_v17 = vadd.f32 %v4849_v50, %v6124_v35  ;;  %v6337_v19 = vadd.f32 %v4879_v41, %v6264_v18  ;;  %v3255_v35 = vsel %vm3094_vm6, %v3245_v34, %v3254_v3  ;;  %v3552_v18 = vrot.slane %v6059_v26, 3 }
 0x13b   : > { %v1186_v51 = vpop.f32.mrf.mxu0  ;;  %v1590_v1 = vpop.f32.mrf.mxu1 }
 0x13c   : > { %v1303_v45 = vadd.f32 %v1186_v51, %v6129_v53  ;;  %v6343_v31 = vadd.f32 %v1590_v1, %v6274_v25  ;;  %v3263_v25 = vor.u32 %v3262_v9, %v3259_v55  ;;  %v3553_v5 = vsel %vm3544_vm7, %v3550_v13, %v3552_v18 }
 0x13d   : > { %v4852_v7 = vpop.f32.mrf.mxu0  ;;  %5067 = vmatmul.mubr.msk.bf16.vlgmr.msra.gmra.mxu0 %vm563_vm2, %v3549_v37  ;;  %v4882_v10 = vpop.f32.mrf.mxu1  ;;  %5057 = vmatmul.mubr.msk.bf16.gmra.mxu1 %vm563_vm2, %v3246_v47  ;;  %v3555_v27 = vsel %vm3544_vm7, %v3552_v18, %v3554_v44  ;;  %v3556_v13 = vrot.slane %v6090_v61, 3 }
 0x13e   : > { %v1308_v23 = vadd.f32 %v4852_v7, %v6135_v14  ;;  %5070 = vmatprep.mubr.msk.bf16.mxu0 %vm563_vm2, %v3551_v32  ;;  %v6351_v0 = vadd.f32 %v4882_v10, %v6281_v15  ;;  %5060 = vmatprep.mubr.msk.bf16.mxu1 %vm563_vm2, %v3255_v35  ;;  %v3264_v41 = vsel %vm3094_vm6, %v3254_v3, %v3263_v25 }
 0x13f   : > { %v1199_v53 = vpop.f32.mrf.mxu0  ;;  %v1603_v34 = vpop.f32.mrf.mxu1  ;;  %v3557_v7 = vsel %vm3544_vm7, %v3554_v44, %v3556_v13 }
 0x140   : > { %v1306_v54 = vadd.f32 %v1199_v53, %v6142_v8  ;;  %v6356_v20 = vadd.f32 %v1603_v34, %v6291_v28  ;;  %v3562_v34 = vrot.slane %v6122_v4, 3 }
 0x141   : > { %v4853_v14 = vpop.f32.mrf.mxu0  ;;  %v4883_v50 = vpop.f32.mrf.mxu1 }
 0x142   : > { %v1309_v26 = vadd.f32 %v4853_v14, %v6152_v29  ;;  %v6362_v15 = vadd.f32 %v4883_v50, %v6299_v62 }
 0x143   : > { %v1202_v37 = vpop.f32.mrf.mxu0  ;;  %v1606_v51 = vpop.f32.mrf.mxu1 }
 0x144   : > { %v1307_v8 = vadd.f32 %v1202_v37, %v6157_v2  ;;  %v6368_v28 = vadd.f32 %v1606_v51, %v6306_v11  ;;  %v3558_v2 = vrot.slane %v6094_v43, 3 }
 0x145   : > { %v4856_v47 = vpop.f32.mrf.mxu0  ;;  %5071 = vmatmul.mubr.msk.bf16.gmra.mxu0 %vm563_vm2, %v3553_v5  ;;  %v4886_v32 = vpop.f32.mrf.mxu1  ;;  %5061 = vmatmul.mubr.msk.bf16.gmra.mxu1 %vm563_vm2, %v3264_v41 }
 0x146   : > { %v1312_v29 = vadd.f32 %v4856_v47, %v6163_v40  ;;  %5074 = vmatprep.mubr.msk.bf16.mxu0 %vm563_vm2, %v3555_v27  ;;  %v6376_v3 = vadd.f32 %v4886_v32, %v6317_v39  ;;  %v3559_v18 = vsel %vm3544_vm7, %v3556_v13, %v3558_v2  ;;  %v7050_v47 = vld [vmem:[#allocation16_spill] sm:$0xff] }
 0x147   : > { %v1215_v62 = vpop.f32.mrf.mxu0  ;;  %v1619_v9 = vpop.f32.mrf.mxu1 }
 0x148   : > { %v1310_v55 = vadd.f32 %v1215_v62, %v6170_v56  ;;  %v6379_v1 = vadd.f32 %v1619_v9, %v1302_v60  ;;  %v7052_v62 = vld [vmem:[#allocation9_spill] sm:$0xff] }
 0x149   : > { %v4857_v11 = vpop.f32.mrf.mxu0  ;;  %v4887_v61 = vpop.f32.mrf.mxu1 }
 0x14a   : > { %v1313_v40 = vadd.f32 %v4857_v11, %v6180_v58  ;;  %v6384_v10 = vadd.f32 %v4887_v61, %v1305_v17  ;;  %v3560_v58 = vrot.slane %v6118_v46, 3 }
 0x14b   : > { %v1218_v35 = vpop.f32.mrf.mxu0  ;;  %v1622_v39 = vpop.f32.mrf.mxu1 }
 0x14c   : > { %v1311_v43 = vadd.f32 %v1218_v35, %v6185_v48  ;;  %v6388_v56 = vadd.f32 %v1622_v39, %v1303_v45  ;;  %v7049_v45 = vld [vmem:[#allocation15_spill] sm:$0xff]  ;;  %v3563_v46 = vsel %vm3544_vm7, %v3560_v58, %v3562_v34  ;;  %v7054_v35 = vld [vmem:[#allocation18_spill] sm:$0xff] }
 0x14d   : > { %v4860_v53 = vpop.f32.mrf.mxu0  ;;  %5075 = vmatmul.mubr.msk.bf16.gmra.mxu0 %vm563_vm2, %v3557_v7  ;;  %v4890_v44 = vpop.f32.mrf.mxu1  ;;  %v7053_v7 = vld [vmem:[#allocation10_spill] sm:$0xff] }
 0x14e   : > { %v1316_v60 = vadd.f32 %v4860_v53, %v6191_v24  ;;  %5078 = vmatprep.mubr.msk.bf16.mxu0 %vm563_vm2, %v3559_v18  ;;  %v6394_v17 = vadd.f32 %v4890_v44, %v1308_v23  ;;  %v3561_v24 = vsel %vm3544_vm7, %v3558_v2, %v3560_v58  ;;  %v3564_v2 = vrot.slane %v7052_v62, 3 }
 0x14f   : > { %v1231_v25 = vpop.f32.mrf.mxu0  ;;  %v1635_v14 = vpop.f32.mrf.mxu1  ;;  %v3566_v61 = vrot.slane %v7053_v7, 3 }
 0x150   : > { %v1314_v48 = vadd.f32 %v1231_v25, %v6198_v33  ;;  %v6397_v50 = vadd.f32 %v1635_v14, %v1306_v54  ;;  %v7051_v54 = vld [vmem:[#allocation17_spill] sm:$0xff]  ;;  %v3565_v44 = vsel %vm3544_vm7, %v3562_v34, %v3564_v2 }
 0x151   : > { %v4861_v5 = vpop.f32.mrf.mxu0  ;;  %v4891_v27 = vpop.f32.mrf.mxu1 }
 0x152   : > { %v1317_v37 = vadd.f32 %v4861_v5, %v7049_v45  ;;  %v6402_v51 = vadd.f32 %v4891_v27, %v1309_v26  ;;  %v3567_v5 = vsel %vm3544_vm7, %v3564_v2, %v3566_v61 }
 0x153   : > { %v1234_v41 = vpop.f32.mrf.mxu0  ;;  %v1638_v23 = vpop.f32.mrf.mxu1 }
 0x154   : > { %v1315_v4 = vadd.f32 %v1234_v41, %v7050_v47  ;;  %v6406_v33 = vadd.f32 %v1638_v23, %v1307_v8  ;;  %v7056_v23 = vld [vmem:[#allocation12_spill] sm:$0xff] }
 0x155   : > { %v4864_v13 = vpop.f32.mrf.mxu0  ;;  %5079 = vmatmul.mubr.msk.bf16.gmra.mxu0 %vm563_vm2, %v3561_v24  ;;  %v4894_v9 = vpop.f32.mrf.mxu1 }
 0x156   : > { %v1320_v32 = vadd.f32 %v4864_v13, %v7051_v54  ;;  %5082 = vmatprep.mubr.msk.bf16.mxu0 %vm563_vm2, %v3563_v46  ;;  %v6412_v26 = vadd.f32 %v4894_v9, %v1312_v29  ;;  %v3570_v13 = vrot.slane %v7056_v23, 3  ;;  %v7057_v54 = vld [vmem:[#allocation20_spill] sm:$0xff] }
 0x157   : > { %v1247_v11 = vpop.f32.mrf.mxu0  ;;  %v1651_v39 = vpop.f32.mrf.mxu1 }
 0x158   : > { %v1318_v18 = vadd.f32 %v1247_v11, %v7054_v35  ;;  %v6415_v58 = vadd.f32 %v1651_v39, %v1310_v55  ;;  %v7058_v39 = vld [vmem:[#allocation5_spill] sm:$0xff] }
 0x159   : > { %v4865_v53 = vpop.f32.mrf.mxu0  ;;  %v4895_v25 = vpop.f32.mrf.mxu1 }
 0x15a   : > { %v1321_v8 = vadd.f32 %v4865_v53, %v6236_v63  ;;  %v6420_v45 = vadd.f32 %v4895_v25, %v1313_v40  ;;  %v7055_v63 = vld [vmem:[#allocation11_spill] sm:$0xff]  ;;  %v1013_v53 = vadd.f32 %v6284_v21, %v7058_v39 }
 0x15b   : > { %v1250_v14 = vpop.f32.mrf.mxu0  ;;  %v1654_v29 = vpop.f32.mrf.mxu1  ;;  %v3568_v34 = vrot.slane %v7055_v63, 3  ;;  %v7060_v63 = vld [vmem:[#allocation14_spill] sm:$0xff]  ;;  %v7061_v21 = vld [vmem:[#allocation7_spill] sm:$0xff] }
 0x15c   : > { %v1319_v24 = vadd.f32 %v1250_v14, %v6241_v22  ;;  %v6424_v41 = vadd.f32 %v1654_v29, %v1311_v43 }
 0x15d   : > { %v4868_v27 = vpop.f32.mrf.mxu0  ;;  %5083 = vmatmul.mubr.msk.bf16.gmra.mxu0 %vm563_vm2, %v3565_v44  ;;  %v4898_v46 = vpop.f32.mrf.mxu1  ;;  %v3571_v35 = vsel %vm3544_vm7, %v3568_v34, %v3570_v13 }
 0x15e   : > { %v1324_v55 = vadd.f32 %v4868_v27, %v6250_v16  ;;  %5086 = vmatprep.mubr.msk.bf16.mxu0 %vm563_vm2, %v3567_v5  ;;  %v6430_v40 = vadd.f32 %v4898_v46, %v1316_v60  ;;  %v3569_v16 = vsel %vm3544_vm7, %v3566_v61, %v3568_v34  ;;  %v7059_v61 = vld [vmem:[#allocation13_spill] sm:$0xff]  ;;  %v3574_v34 = vrot.slane %v7060_v63, 3 }
 0x15f   : > { %v1263_v47 = vpop.f32.mrf.mxu0  ;;  %v1667_v62 = vpop.f32.mrf.mxu1  ;;  %v3572_v5 = vrot.slane %v7059_v61, 3 }
 0x160   : > { %v1322_v22 = vadd.f32 %v1263_v47, %v7057_v54  ;;  %v6433_v9 = vadd.f32 %v1667_v62, %v1314_v48 }
 0x161   : > { %v4869_v2 = vpop.f32.mrf.mxu0  ;;  %v4899_v11 = vpop.f32.mrf.mxu1  ;;  %v3573_v54 = vsel %vm3544_vm7, %v3570_v13, %v3572_v5  ;;  %v3576_v13 = vrot.slane %v6230_v6, 3 }
 0x162   : > { %v1325_v43 = vadd.f32 %v4869_v2, %v6271_v36  ;;  %v6440_v44 = vadd.f32 %v4899_v11, %v1317_v37  ;;  %v1016_v37 = vadd.f32 %v6302_v59, %v7061_v21  ;;  %v7062_v59 = vld [vmem:[#allocation19_spill] sm:$0xff] }
 0x163   : > { %v1266_v7 = vpop.f32.mrf.mxu0  ;;  %v1670_v25 = vpop.f32.mrf.mxu1 }
 0x164   : > { %v1323_v60 = vadd.f32 %v1266_v7, %v6278_v49  ;;  %v6444_v48 = vadd.f32 %v1670_v25, %v1315_v4 }
 0x165   : > { %v4872_v14 = vpop.f32.mrf.mxu0  ;;  %5087 = vmatmul.mubr.msk.bf16.gmra.mxu0 %vm563_vm2, %v3569_v16  ;;  %v4902_v29 = vpop.f32.mrf.mxu1  ;;  %v3575_v16 = vsel %vm3544_vm7, %v3572_v5, %v3574_v34 }
 0x166   : > { %v1328_v36 = vadd.f32 %v4872_v14, %v1013_v53  ;;  %5090 = vmatprep.mubr.msk.bf16.mxu0 %vm563_vm2, %v3571_v35  ;;  %v6451_v46 = vadd.f32 %v4902_v29, %v1320_v32  ;;  %v1730_v32 = vadd.f32 %v6330_v12, %v7062_v59 }
 0x167   : > { %v1279_v27 = vpop.f32.mrf.mxu0  ;;  %v1683_v49 = vpop.f32.mrf.mxu1 }
 0x168   : > { %v6453_v23 = vadd.f32 %v1683_v49, %v1318_v18 }
 0x169   : > { %v4873_v47 = vpop.f32.mrf.mxu0  ;;  %v4903_v62 = vpop.f32.mrf.mxu1 }
 0x16a   : > { %v1329_v4 = vadd.f32 %v4873_v47, %v1016_v37  ;;  %v6457_v11 = vadd.f32 %v4903_v62, %v1321_v8  ;;  %v3578_v8 = vrot.slane %v6234_v30, 3  ;;  %v7063_v47 = vld [vmem:[#allocation6_spill] sm:$0xff] }
 0x16b   : > { %v1282_v2 = vpop.f32.mrf.mxu0  ;;  %v1686_v7 = vpop.f32.mrf.mxu1 }
 0x16c   : > { %v6462_v39 = vadd.f32 %v1686_v7, %v1319_v24  ;;  %v3577_v24 = vsel %vm3544_vm7, %v3574_v34, %v3576_v13  ;;  %v3579_v37 = vsel %vm3544_vm7, %v3576_v13, %v3578_v8  ;;  %v3580_v34 = vrot.slane %v6310_v38, 3 }
 0x16d   : > { %v4916_v35 = vpop.f32.mrf.mxu0  ;;  %5091 = vmatmul.mubr.msk.bf16.gmra.mxu0 %vm563_vm2, %v3573_v54  ;;  %v4906_v53 = vpop.f32.mrf.mxu1 }
 0x16e   : > { %v2300_v18 = vadd.f32 %v4916_v35, %v6324_v52  ;;  %5094 = vmatprep.mubr.msk.bf16.mxu0 %vm563_vm2, %v3575_v16  ;;  %v6468_v14 = vadd.f32 %v4906_v53, %v1324_v55  ;;  %v3581_v13 = vsel %vm3544_vm7, %v3578_v8, %v3580_v34 }
 0x16f   : > { %v2155_v25 = vpop.f32.mrf.mxu0  ;;  %v1699_v5 = vpop.f32.mrf.mxu1 }
 0x170   : > { %v2298_v61 = vadd.f32 %v2155_v25, %v1730_v32  ;;  %v6470_v63 = vadd.f32 %v1699_v5, %v1322_v22  ;;  %v1005_v22 = vadd.f32 %v6294_v57, %v7063_v47  ;;  %v7064_v32 = vld [vmem:[#allocation8_spill] sm:$0xff] }
 0x171   : > { %v4917_v29 = vpop.f32.mrf.mxu0  ;;  %v4907_v52 = vpop.f32.mrf.mxu1  ;;  %v1008_v57 = vadd.f32 %v6312_v42, %v7064_v32 }
 0x172   : > { %v2301_v12 = vadd.f32 %v4917_v29, %v6337_v19  ;;  %v6475_v6 = vadd.f32 %v4907_v52, %v1325_v43  ;;  %v1326_v16 = vadd.f32 %v1279_v27, %v1005_v22 }
 0x173   : > { %v2158_v21 = vpop.f32.mrf.mxu0  ;;  %v1702_v30 = vpop.f32.mrf.mxu1  ;;  %v1327_v25 = vadd.f32 %v1282_v2, %v1008_v57 }
 0x174   : > { %v2299_v49 = vadd.f32 %v2158_v21, %v6343_v31  ;;  %v6481_v54 = vadd.f32 %v1702_v30, %v1323_v60 }
 0x175   : > { %v4920_v55 = vpop.f32.mrf.mxu0  ;;  %5095 = vmatmul.mubr.msk.bf16.gmra.mxu0 %vm563_vm2, %v3577_v24  ;;  %v4910_v62 = vpop.f32.mrf.mxu1 }
 0x176   : > { %v2304_v19 = vadd.f32 %v4920_v55, %v6351_v0  ;;  %5098 = vmatprep.mubr.msk.bf16.mxu0 %vm563_vm2, %v3579_v37  ;;  %v6486_v7 = vadd.f32 %v4910_v62, %v1328_v36 }
 0x177   : > { %v2171_v43 = vpop.f32.mrf.mxu0  ;;  %v1715_v35 = vpop.f32.mrf.mxu1 }
 0x178   : > { %v2302_v31 = vadd.f32 %v2171_v43, %v6356_v20  ;;  %v6491_v60 = vadd.f32 %v1715_v35, %v1326_v16 }
 0x179   : > { %v4921_v59 = vpop.f32.mrf.mxu0  ;;  %v4911_v53 = vpop.f32.mrf.mxu1 }
 0x17a   : > { %v2305_v0 = vadd.f32 %v4921_v59, %v6362_v15  ;;  %v6495_v5 = vadd.f32 %v4911_v53, %v1329_v4 }
 0x17b   : > { %v2174_v38 = vpop.f32.mrf.mxu0  ;;  %v1718_v27 = vpop.f32.mrf.mxu1 }
 0x17c   : > { %v2303_v36 = vadd.f32 %v2174_v38, %v6368_v28  ;;  %v6499_v29 = vadd.f32 %v1718_v27, %v1327_v25 }
 0x17d   : > { %v4924_v20 = vpop.f32.mrf.mxu0  ;;  %5099 = vmatmul.mubr.msk.bf16.gmra.mxu0 %vm563_vm2, %v3581_v13  ;;  %v4954_v24 = vpop.f32.mrf.mxu1 }
 0x17e   : > { %v2308_v42 = vadd.f32 %v4924_v20, %v6376_v3  ;;  %v6502_v15 = vadd.f32 %v4954_v24, %v2300_v18 }
 0x17f   : > { %v2187_v52 = vpop.f32.mrf.mxu0  ;;  %v2472_v21 = vpop.f32.mrf.mxu1 }
 0x180   : > { %v2306_v8 = vadd.f32 %v2187_v52, %v6379_v1  ;;  %v6505_v4 = vadd.f32 %v2472_v21, %v2298_v61 }
 0x181   : > { %v4925_v2 = vpop.f32.mrf.mxu0  ;;  %v4955_v37 = vpop.f32.mrf.mxu1 }
 0x182   : > { %v2309_v28 = vadd.f32 %v4925_v2, %v6384_v10  ;;  %v6508_v55 = vadd.f32 %v4955_v37, %v2301_v12 }
 0x183   : > { %v2190_v30 = vpop.f32.mrf.mxu0  ;;  %v2475_v22 = vpop.f32.mrf.mxu1 }
 0x184   : > { %v2307_v47 = vadd.f32 %v2190_v30, %v6388_v56  ;;  %v6511_v34 = vadd.f32 %v2475_v22, %v2299_v49 }
 0x185   : > { %v4928_v3 = vpop.f32.mrf.mxu0  ;;  %v4958_v62 = vpop.f32.mrf.mxu1 }
 0x186   : > { %v2312_v18 = vadd.f32 %v4928_v3, %v6394_v17  ;;  %v6514_v43 = vadd.f32 %v4958_v62, %v2304_v19 }
 0x187   : > { %v2203_v1 = vpop.f32.mrf.mxu0  ;;  %v2488_v16 = vpop.f32.mrf.mxu1 }
 0x188   : > { %v2310_v61 = vadd.f32 %v2203_v1, %v6397_v50  ;;  %v6517_v35 = vadd.f32 %v2488_v16, %v2302_v31 }
 0x189   : > { %v4929_v10 = vpop.f32.mrf.mxu0  ;;  %v4959_v59 = vpop.f32.mrf.mxu1 }
 0x18a   : > { %v2313_v12 = vadd.f32 %v4929_v10, %v6402_v51  ;;  %v6520_v32 = vadd.f32 %v4959_v59, %v2305_v0 }
 0x18b   : > { %v2206_v56 = vpop.f32.mrf.mxu0  ;;  %v2491_v57 = vpop.f32.mrf.mxu1 }
 0x18c   : > { %v2311_v49 = vadd.f32 %v2206_v56, %v6406_v33  ;;  %v6523_v13 = vadd.f32 %v2491_v57, %v2303_v36 }
 0x18d   : > { %v4932_v17 = vpop.f32.mrf.mxu0  ;;  %v4962_v53 = vpop.f32.mrf.mxu1 }
 0x18e   : > { %v2316_v19 = vadd.f32 %v4932_v17, %v6412_v26  ;;  %v6526_v38 = vadd.f32 %v4962_v53, %v2308_v42 }
 0x18f   : > { %v2219_v50 = vpop.f32.mrf.mxu0  ;;  %v2504_v25 = vpop.f32.mrf.mxu1 }
 0x190   : > { %v2314_v31 = vadd.f32 %v2219_v50, %v6415_v58  ;;  %v6529_v27 = vadd.f32 %v2504_v25, %v2306_v8 }
 0x191   : > { %v4933_v51 = vpop.f32.mrf.mxu0  ;;  %v4963_v20 = vpop.f32.mrf.mxu1 }
 0x192   : > { %v2317_v0 = vadd.f32 %v4933_v51, %v6420_v45  ;;  %v6532_v24 = vadd.f32 %v4963_v20, %v2309_v28 }
 0x193   : > { %v2222_v33 = vpop.f32.mrf.mxu0  ;;  %v2507_v52 = vpop.f32.mrf.mxu1 }
 0x194   : > { %v2315_v36 = vadd.f32 %v2222_v33, %v6424_v41  ;;  %v6535_v21 = vadd.f32 %v2507_v52, %v2307_v47 }
 0x195   : > { %v4936_v26 = vpop.f32.mrf.mxu0  ;;  %v4966_v2 = vpop.f32.mrf.mxu1 }
 0x196   : > { %v2320_v42 = vadd.f32 %v4936_v26, %v6430_v40  ;;  %v6538_v37 = vadd.f32 %v4966_v2, %v2312_v18 }
 0x197   : > { %v2235_v58 = vpop.f32.mrf.mxu0  ;;  %v2520_v30 = vpop.f32.mrf.mxu1 }
 0x198   : > { %v2318_v8 = vadd.f32 %v2235_v58, %v6433_v9  ;;  %v6541_v22 = vadd.f32 %v2520_v30, %v2310_v61 }
 0x199   : > { %v4937_v45 = vpop.f32.mrf.mxu0  ;;  %v4967_v3 = vpop.f32.mrf.mxu1 }
 0x19a   : > { %v2321_v28 = vadd.f32 %v4937_v45, %v6440_v44  ;;  %v6544_v62 = vadd.f32 %v4967_v3, %v2313_v12 }
 0x19b   : > { %v2238_v41 = vpop.f32.mrf.mxu0  ;;  %v2523_v1 = vpop.f32.mrf.mxu1 }
 0x19c   : > { %v2319_v47 = vadd.f32 %v2238_v41, %v6444_v48  ;;  %v6547_v16 = vadd.f32 %v2523_v1, %v2311_v49 }
 0x19d   : > { %v4940_v40 = vpop.f32.mrf.mxu0  ;;  %v4970_v10 = vpop.f32.mrf.mxu1 }
 0x19e   : > { %v2324_v18 = vadd.f32 %v4940_v40, %v6451_v46  ;;  %v6550_v59 = vadd.f32 %v4970_v10, %v2316_v19 }
 0x19f   : > { %v2251_v9 = vpop.f32.mrf.mxu0  ;;  %v2536_v56 = vpop.f32.mrf.mxu1 }
 0x1a0   : > { %v2322_v61 = vadd.f32 %v2251_v9, %v6453_v23  ;;  %v6553_v57 = vadd.f32 %v2536_v56, %v2314_v31 }
 0x1a1   : > { %v4941_v44 = vpop.f32.mrf.mxu0  ;;  %v4971_v17 = vpop.f32.mrf.mxu1 }
 0x1a2   : > { %v2325_v12 = vadd.f32 %v4941_v44, %v6457_v11  ;;  %v6556_v53 = vadd.f32 %v4971_v17, %v2317_v0 }
 0x1a3   : > { %v2254_v48 = vpop.f32.mrf.mxu0  ;;  %v2539_v50 = vpop.f32.mrf.mxu1 }
 0x1a4   : > { %v2323_v49 = vadd.f32 %v2254_v48, %v6462_v39  ;;  %v6559_v25 = vadd.f32 %v2539_v50, %v2315_v36 }
 0x1a5   : > { %v4944_v46 = vpop.f32.mrf.mxu0  ;;  %v4974_v51 = vpop.f32.mrf.mxu1 }
 0x1a6   : > { %v2328_v19 = vadd.f32 %v4944_v46, %v6468_v14  ;;  %v6562_v20 = vadd.f32 %v4974_v51, %v2320_v42 }
 0x1a7   : > { %v2267_v23 = vpop.f32.mrf.mxu0  ;;  %v2552_v33 = vpop.f32.mrf.mxu1 }
 0x1a8   : > { %v2326_v31 = vadd.f32 %v2267_v23, %v6470_v63  ;;  %v6565_v52 = vadd.f32 %v2552_v33, %v2318_v8 }
 0x1a9   : > { %v4945_v11 = vpop.f32.mrf.mxu0  ;;  %v4975_v26 = vpop.f32.mrf.mxu1 }
 0x1aa   : > { %v2329_v0 = vadd.f32 %v4945_v11, %v6475_v6  ;;  %v6568_v2 = vadd.f32 %v4975_v26, %v2321_v28 }
 0x1ab   : > { %v2270_v39 = vpop.f32.mrf.mxu0  ;;  %v2555_v58 = vpop.f32.mrf.mxu1 }
 0x1ac   : > { %v2327_v36 = vadd.f32 %v2270_v39, %v6481_v54  ;;  %v6571_v30 = vadd.f32 %v2555_v58, %v2319_v47 }
 0x1ad   : > { %v4948_v14 = vpop.f32.mrf.mxu0  ;;  %v4978_v45 = vpop.f32.mrf.mxu1 }
 0x1ae   : > { %v2332_v42 = vadd.f32 %v4948_v14, %v6486_v7  ;;  %v6574_v3 = vadd.f32 %v4978_v45, %v2324_v18 }
 0x1af   : > { %v2283_v63 = vpop.f32.mrf.mxu0  ;;  %v2568_v41 = vpop.f32.mrf.mxu1 }
 0x1b0   : > { %v2330_v8 = vadd.f32 %v2283_v63, %v6491_v60  ;;  %v6577_v1 = vadd.f32 %v2568_v41, %v2322_v61 }
 0x1b1   : > { %v4949_v6 = vpop.f32.mrf.mxu0  ;;  %v4979_v40 = vpop.f32.mrf.mxu1 }
 0x1b2   : > { %v2333_v28 = vadd.f32 %v4949_v6, %v6495_v5  ;;  %v6580_v10 = vadd.f32 %v4979_v40, %v2325_v12 }
 0x1b3   : > { %v2286_v54 = vpop.f32.mrf.mxu0  ;;  %v2571_v9 = vpop.f32.mrf.mxu1 }
 0x1b4   : > { %v2331_v47 = vadd.f32 %v2286_v54, %v6499_v29  ;;  %v6583_v56 = vadd.f32 %v2571_v9, %v2323_v49 }
 0x1b5   : > { %v4992_v7 = vpop.f32.mrf.mxu0  ;;  %v4982_v44 = vpop.f32.mrf.mxu1 }
 0x1b6   : > { %v3055_v18 = vadd.f32 %v4992_v7, %v6502_v15  ;;  %v6586_v17 = vadd.f32 %v4982_v44, %v2328_v19 }
 0x1b7   : > { %v2910_v60 = vpop.f32.mrf.mxu0  ;;  %v2584_v48 = vpop.f32.mrf.mxu1 }
 0x1b8   : > { %v3053_v61 = vadd.f32 %v2910_v60, %v6505_v4  ;;  %v6589_v50 = vadd.f32 %v2584_v48, %v2326_v31 }
 0x1b9   : > { %v4993_v5 = vpop.f32.mrf.mxu0  ;;  %v4983_v46 = vpop.f32.mrf.mxu1 }
 0x1ba   : > { %v3056_v12 = vadd.f32 %v4993_v5, %v6508_v55  ;;  %v6592_v51 = vadd.f32 %v4983_v46, %v2329_v0 }
 0x1bb   : > { %v2913_v29 = vpop.f32.mrf.mxu0  ;;  %v2587_v23 = vpop.f32.mrf.mxu1 }
 0x1bc   : > { %v3054_v49 = vadd.f32 %v2913_v29, %v6511_v34  ;;  %v6595_v33 = vadd.f32 %v2587_v23, %v2327_v36 }
 0x1bd   : > { %v4996_v15 = vpop.f32.mrf.mxu0  ;;  %v4986_v11 = vpop.f32.mrf.mxu1 }
 0x1be   : > { %v3059_v19 = vadd.f32 %v4996_v15, %v6514_v43  ;;  %v6598_v26 = vadd.f32 %v4986_v11, %v2332_v42 }
 0x1bf   : > { %v2926_v4 = vpop.f32.mrf.mxu0  ;;  %v2600_v39 = vpop.f32.mrf.mxu1 }
 0x1c0   : > { %v3057_v31 = vadd.f32 %v2926_v4, %v6517_v35  ;;  %v6601_v58 = vadd.f32 %v2600_v39, %v2330_v8 }
 0x1c1   : > { %v4997_v55 = vpop.f32.mrf.mxu0  ;;  %v4987_v14 = vpop.f32.mrf.mxu1 }
 0x1c2   : > { %v3060_v0 = vadd.f32 %v4997_v55, %v6520_v32  ;;  %v6604_v45 = vadd.f32 %v4987_v14, %v2333_v28 }
 0x1c3   : > { %v2929_v34 = vpop.f32.mrf.mxu0  ;;  %v2603_v63 = vpop.f32.mrf.mxu1 }
 0x1c4   : > { %v3058_v36 = vadd.f32 %v2929_v34, %v6523_v13  ;;  %v6607_v41 = vadd.f32 %v2603_v63, %v2331_v47 }
 0x1c5   : > { %v5000_v43 = vpop.f32.mrf.mxu0  ;;  %v5030_v35 = vpop.f32.mrf.mxu1 }
 0x1c6   : > { %v6610_v42 = vadd.f32 %v5000_v43, %v6526_v38  ;;  %v6612_v40 = vadd.f32 %v5030_v35, %v3055_v18 }
 0x1c7   : > { %v2942_v6 = vpop.f32.mrf.mxu0  ;;  %v3360_v32 = vpop.f32.mrf.mxu1 }
 0x1c8   : > { %v6615_v8 = vadd.f32 %v2942_v6, %v6529_v27  ;;  %v6617_v28 = vadd.f32 %v3360_v32, %v3053_v61 }
 0x1c9   : > { %v5001_v54 = vpop.f32.mrf.mxu0  ;;  %v5031_v9 = vpop.f32.mrf.mxu1 }
 0x1ca   : > { %v6620_v13 = vadd.f32 %v5001_v54, %v6532_v24  ;;  %v6622_v7 = vadd.f32 %v5031_v9, %v3056_v12 }
 0x1cb   : > { %v2945_v47 = vpop.f32.mrf.mxu0  ;;  %v3363_v44 = vpop.f32.mrf.mxu1 }
 0x1cc   : > { %v6625_v38 = vadd.f32 %v2945_v47, %v6535_v21  ;;  %v6627_v60 = vadd.f32 %v3363_v44, %v3054_v49 }
 0x1cd   : > { %v5004_v18 = vpop.f32.mrf.mxu0  ;;  %v5034_v48 = vpop.f32.mrf.mxu1 }
 0x1ce   : > { %v6630_v27 = vadd.f32 %v5004_v18, %v6538_v37  ;;  %v6632_v5 = vadd.f32 %v5034_v48, %v3059_v19 }
 0x1cf   : > { %v2958_v61 = vpop.f32.mrf.mxu0  ;;  %v3376_v46 = vpop.f32.mrf.mxu1 }
 0x1d0   : > { %v6635_v24 = vadd.f32 %v2958_v61, %v6541_v22  ;;  %v6637_v29 = vadd.f32 %v3376_v46, %v3057_v31 }
 0x1d1   : > { %v5005_v12 = vpop.f32.mrf.mxu0  ;;  %v5035_v23 = vpop.f32.mrf.mxu1 }
 0x1d2   : > { %v6640_v21 = vadd.f32 %v5005_v12, %v6544_v62  ;;  %v6642_v15 = vadd.f32 %v5035_v23, %v3060_v0  ;;  %v3933_v0 = vlaneseq }
 0x1d3   : > { %v2961_v49 = vpop.f32.mrf.mxu0  ;;  %v3379_v11 = vpop.f32.mrf.mxu1 }
 0x1d4   : > { %v6645_v37 = vadd.f32 %v2961_v49, %v6547_v16  ;;  %v6647_v4 = vadd.f32 %v3379_v11, %v3058_v36  ;;  %v3934_v36 = vshrl.u32 %v3933_v0, 7 }
 0x1d5   : > { %v5008_v19 = vpop.f32.mrf.mxu0  ;;  %v6658_v14 = vpop.f32.mrf.mxu1 }
 0x1d6   : > { %v6650_v22 = vadd.f32 %v5008_v19, %v6550_v59  ;;  %v3939_v43 = vsub.s32 1, %v3934_v36  ;;  %v3935_v6 = vsub.s32 0, %v3934_v36  ;;  %v3943_v32 = vsub.s32 2, %v3934_v36 }
 0x1d7   : > { %v2974_v39 = vpop.f32.mrf.mxu0  ;;  %v6666_v35 = vpop.f32.mrf.mxu1 }
 0x1d8   : > { %7065 = vst [vmem:[#allocation15_spill] sm:$0xff] %v6650_v22  ;;  %v6653_v31 = vadd.f32 %v2974_v39, %v6553_v57 }
 0x1d9   : > { %v5009_v62 = vpop.f32.mrf.mxu0  ;;  %v6681_v18 = vpop.f32.mrf.mxu1 }
 0x1da   : > { %7066 = vst [vmem:[#allocation16_spill] sm:$0xff] %v6653_v31  ;;  %v6656_v55 = vadd.f32 %v5009_v62, %v6556_v53  ;;  %v3931_v53 = vld [vmem:[%s7020_s3] sm:$0x7] }
 0x1db   : > { %v2977_v16 = vpop.f32.mrf.mxu0  ;;  %v6674_v47 = vrot.slane %v3931_v53, %v3935_v6  ;;  %v6676_v44 = vrot.slane %v3931_v53, %v3943_v32  ;;  %v6689_v12 = vpop.f32.mrf.mxu1 }
 0x1dc   : > { %7067 = vst [vmem:[#allocation17_spill] sm:$0xff] %v6656_v55  ;;  %v6661_v34 = vadd.f32 %v2977_v16, %v6559_v25  ;;  %v3940_v25 = vrot.slane %v3931_v53, %v3939_v43 }
 0x1dd   : > { %v5012_v63 = vpop.f32.mrf.mxu0  ;;  %7069 = vst [vmem:[#allocation10_spill] sm:$0xff] %v6674_v47  ;;  %7070 = vst [vmem:[#allocation18_spill] sm:$0xff] %v6676_v44  ;;  %v6697_v19 = vpop.f32.mrf.mxu1 }
 0x1de   : > { %7068 = vst [vmem:[#allocation9_spill] sm:$0xff] %v6661_v34  ;;  %v6664_v59 = vadd.f32 %v5012_v63, %v6562_v20  ;;  %4018 = vmatprep.mubr.f32.mxu1 %v3940_v25 }
 0x1df   : > { %v2990_v57 = vpop.f32.mrf.mxu0  ;;  %v6705_v0 = vpop.f32.mrf.mxu1 }
 0x1e0   : > { %v6672_v54 = vadd.f32 %v2990_v57, %v6565_v52 }
 0x1e1   : > { %v5013_v9 = vpop.f32.mrf.mxu0  ;;  %v6713_v63 = vpop.f32.mrf.mxu1 }
 0x1e2   : > { %v6679_v20 = vadd.f32 %v5013_v9, %v6568_v2 }
 0x1e3   : > { %v2993_v48 = vpop.f32.mrf.mxu0  ;;  %v6721_v53 = vpop.f32.mrf.mxu1 }
 0x1e4   : > { %v6684_v61 = vadd.f32 %v2993_v48, %v6571_v30 }
 0x1e5   : > { %v5016_v46 = vpop.f32.mrf.mxu0  ;;  %v6729_v25 = vpop.f32.mrf.mxu1 }
 0x1e6   : > { %v6687_v52 = vadd.f32 %v5016_v46, %v6574_v3  ;;  %7074 = vst [vmem:[#allocation5_spill] sm:$0xff] %v6729_v25  ;;  %v3517_v25 = vadd.f32 %v6697_v19, %v6630_v27 }
 0x1e7   : > { %v3006_v23 = vpop.f32.mrf.mxu0  ;;  %v6737_v46 = vpop.f32.mrf.mxu1 }
 0x1e8   : > { %v6692_v49 = vadd.f32 %v3006_v23, %v6577_v1  ;;  %7077 = vst [vmem:[#allocation7_spill] sm:$0xff] %v6737_v46 }
 0x1e9   : > { %v5017_v11 = vpop.f32.mrf.mxu0 }
 0x1ea   : > { %v6695_v2 = vadd.f32 %v5017_v11, %v6580_v10 }
 0x1eb   : > { %v3009_v39 = vpop.f32.mrf.mxu0 }
 0x1ec   : > { %v6700_v30 = vadd.f32 %v3009_v39, %v6583_v56  ;;  %v6745_v39 = vpop.f32.mrf.mxu1 }
 0x1ed   : > { %v5020_v62 = vpop.f32.mrf.mxu0  ;;  %7080 = vst [vmem:[#allocation8_spill] sm:$0xff] %v6745_v39 }
 0x1ee   : > { %v6703_v3 = vadd.f32 %v5020_v62, %v6586_v17 }
 0x1ef   : > { %v3022_v16 = vpop.f32.mrf.mxu0 }
 0x1f0   : > { %v6708_v1 = vadd.f32 %v3022_v16, %v6589_v50 }
 0x1f1   : > { %v5021_v36 = vpop.f32.mrf.mxu0 }
 0x1f2   : > { %v6711_v10 = vadd.f32 %v5021_v36, %v6592_v51  ;;  %v6753_v36 = vpop.f32.mrf.mxu1 }
 0x1f3   : > { %v3025_v43 = vpop.f32.mrf.mxu0  ;;  %7083 = vst [vmem:[#allocation23_spill] sm:$0xff] %v6753_v36 }
 0x1f4   : > { %v6716_v56 = vadd.f32 %v3025_v43, %v6595_v33 }
 0x1f5   : > { %v5024_v57 = vpop.f32.mrf.mxu0 }
 0x1f6   : > { %v6719_v17 = vadd.f32 %v5024_v57, %v6598_v26 }
 0x1f7   : > { %v3038_v6 = vpop.f32.mrf.mxu0 }
 0x1f8   : > { %7071 = vst [vmem:[#allocation11_spill] sm:$0xff] %v6719_v17  ;;  %v6724_v50 = vadd.f32 %v3038_v6, %v6601_v58  ;;  %v6761_v6 = vpop.f32.mrf.mxu1 }
 0x1f9   : > { %v5025_v32 = vpop.f32.mrf.mxu0 }
 0x1fa   : > { %7072 = vst [vmem:[#allocation12_spill] sm:$0xff] %v6724_v50  ;;  %v6727_v51 = vadd.f32 %v5025_v32, %v6604_v45 }
 0x1fb   : > { %v3041_v9 = vpop.f32.mrf.mxu0 }
 0x1fc   : > { %7073 = vst [vmem:[#allocation20_spill] sm:$0xff] %v6727_v51  ;;  %v6732_v33 = vadd.f32 %v3041_v9, %v6607_v41 }
 0x1fd   : > { %v5068_v48 = vpop.f32.mrf.mxu0 }
 0x1fe   : > { %7075 = vst [vmem:[#allocation13_spill] sm:$0xff] %v6732_v33  ;;  %v6735_v26 = vadd.f32 %v5068_v48, %v6612_v40 }
 0x1ff   : > { %v3673_v23 = vpop.f32.mrf.mxu0 }
 0x200   : > { %7076 = vst [vmem:[#allocation14_spill] sm:$0xff] %v6735_v26  ;;  %v6740_v58 = vadd.f32 %v3673_v23, %v6617_v28 }
 0x201   : > { %v5069_v11 = vpop.f32.mrf.mxu0 }
 0x202   : > { %7078 = vst [vmem:[#allocation19_spill] sm:$0xff] %v6740_v58  ;;  %v6743_v45 = vadd.f32 %v5069_v11, %v6622_v7 }
 0x203   : > { %v3676_v62 = vpop.f32.mrf.mxu0 }
 0x204   : > { %7079 = vst [vmem:[#allocation6_spill] sm:$0xff] %v6743_v45  ;;  %v6748_v41 = vadd.f32 %v3676_v62, %v6627_v60 }
 0x205   : > { %v5072_v16 = vpop.f32.mrf.mxu0 }
 0x206   : > { %7081 = vst [vmem:[#allocation21_spill] sm:$0xff] %v6748_v41  ;;  %v6751_v40 = vadd.f32 %v5072_v16, %v6632_v5  ;;  %v6768_v5 = vpop.f32.mrf.mxu1 }
 0x207   : > { %v3689_v43 = vpop.f32.mrf.mxu0  ;;  %7087 = vst [vmem:[#allocation27_spill] sm:$0xff] %v6768_v5 }
 0x208   : > { %7082 = vst [vmem:[#allocation22_spill] sm:$0xff] %v6751_v40  ;;  %v6756_v28 = vadd.f32 %v3689_v43, %v6637_v29  ;;  %v6772_v11 = vpop.f32.mrf.mxu1 }
 0x209   : > { %v5073_v57 = vpop.f32.mrf.mxu0 }
 0x20a   : > { %7084 = vst [vmem:[#allocation24_spill] sm:$0xff] %v6756_v28  ;;  %v6759_v7 = vadd.f32 %v5073_v57, %v6642_v15  ;;  %v6776_v15 = vpop.f32.mrf.mxu1 }
 0x20b   : > { %v3692_v32 = vpop.f32.mrf.mxu0 }
 0x20c   : > { %7085 = vst [vmem:[#allocation25_spill] sm:$0xff] %v6759_v7  ;;  %v6764_v60 = vadd.f32 %v3692_v32, %v6647_v4  ;;  %v5054_v57 = vpop.f32.mrf.mxu1  ;;  %v3516_v7 = vadd.f32 %v6721_v53, %v6645_v37 }
 0x20d   : > { %v6766_v9 = vpop.f32.mrf.mxu0 }
 0x20e   : > { %7086 = vst [vmem:[#allocation26_spill] sm:$0xff] %v6764_v60  ;;  %v6780_v32 = vpop.f32.mrf.mxu1  ;;  %v3518_v60 = vadd.f32 %v6713_v63, %v6640_v21  ;;  %v6807_v21 = vld [vmem:[%s7019_s2] ss:$0 sm:$0xff]  ;;  %v3515_v63 = vadd.f32 %v6705_v0, %v6635_v24  ;;  %v3529_v24 = vadd.f32 %v5054_v57, %v6687_v52  ;;  %v3512_v52 = vadd.f32 %v6689_v12, %v6625_v38 }
 0x20f   : > { %v6770_v48 = vpop.f32.mrf.mxu0  ;;  %v3524_v57 = vadd.f32 %v6776_v15, %v6684_v61 }
 0x210   : > { %v5055_v33 = vpop.f32.mrf.mxu1 }
 0x211   : > { %v5077_v23 = vpop.f32.mrf.mxu0 }
 0x212   : > { %v3459_v41 = vpop.f32.mrf.mxu1 }
 0x213   : > { %v6774_v29 = vpop.f32.mrf.mxu0  ;;  %v7096_v61 = vld [vmem:[#allocation25_spill] sm:$0xff] }
 0x214   : > { %v5058_v45 = vpop.f32.mrf.mxu1  ;;  %v3825_v38 = vadd.f32 %v6774_v29, %v3512_v52  ;;  %v7105_v52 = vld [vmem:[#allocation9_spill] sm:$0xff] }
 0x215   : > { %v5080_v62 = vpop.f32.mrf.mxu0 }
 0x216   : > { %v3472_v28 = vpop.f32.mrf.mxu1 }
 0x217   : > { %v3721_v16 = vpop.f32.mrf.mxu0 }
 0x219   : > { %v5081_v43 = vpop.f32.mrf.mxu0 }
 0x21a   : > { %v3831_v40 = vadd.f32 %v5081_v43, %v3518_v60 }
 0x21b   : > { %v3724_v44 = vpop.f32.mrf.mxu0 }
 0x21c   : > { %v3829_v37 = vadd.f32 %v3724_v44, %v3516_v7  ;;  %v3513_v44 = vadd.f32 %v6658_v14, %v6610_v42  ;;  %v3527_v42 = vadd.f32 %v6780_v32, %v6692_v49 }
 0x21d   : > { %v6778_v4 = vpop.f32.mrf.mxu0 }
 0x21e   : > { %7088 = vst [vmem:[#allocation28_spill] sm:$0xff] %v6778_v4 }
 0x21f   : > { %v6782_v47 = vpop.f32.mrf.mxu0 }
 0x220   : > { %7089 = vst [vmem:[#allocation29_spill] sm:$0xff] %v6782_v47  ;;  %v5059_v47 = vpop.f32.mrf.mxu1 }
 0x221   : > { %v6784_v50 = vpop.f32.mrf.mxu0  ;;  %v3534_v39 = vadd.f32 %v5059_v47, %v6711_v10  ;;  %v3530_v47 = vadd.f32 %v5055_v33, %v6695_v2  ;;  %v3874_v10 = vadd.f32 %v6807_v21, %v3831_v40  ;;  %v3528_v40 = vadd.f32 %v3459_v41, %v6700_v30 }
 0x222   : > { %7090 = vst [vmem:[#allocation30_spill] sm:$0xff] %v6784_v50  ;;  %v3533_v50 = vadd.f32 %v5058_v45, %v6703_v3  ;;  %v3475_v22 = vpop.f32.mrf.mxu1  ;;  %v3531_v3 = vadd.f32 %v3472_v28, %v6708_v1  ;;  %v3514_v1 = vadd.f32 %v6681_v18, %v6620_v13  ;;  %v3511_v41 = vadd.f32 %v6666_v35, %v6615_v8 }
 0x223   : > { %v6786_v58 = vpop.f32.mrf.mxu0  ;;  %v3532_v27 = vadd.f32 %v3475_v22, %v6716_v56  ;;  %v3828_v56 = vadd.f32 %v3721_v16, %v3515_v63  ;;  %v3525_v8 = vadd.f32 %v6761_v6, %v6664_v59  ;;  %v7094_v6 = vld [vmem:[#allocation27_spill] sm:$0xff] }
 0x224   : > { %7091 = vst [vmem:[#allocation31_spill] sm:$0xff] %v6786_v58 }
 0x225   : > { %v6788_v17 = vpop.f32.mrf.mxu0  ;;  %v3871_v7 = vadd.f32 %v6807_v21, %v3828_v56 }
 0x227   : > { %v6790_v51 = vpop.f32.mrf.mxu0  ;;  %v3907_v16 = vmax.f32 %v3871_v7, 0.0  ;;  %v7107_v7 = vld [vmem:[#allocation28_spill] sm:$0xff] }
 0x228   : > { %7092 = vst [vmem:[#allocation32_spill] sm:$0xff] %v6790_v51 }
 0x229   : > { %v6792_v26 = vpop.f32.mrf.mxu0 }
 0x22b   : > { %v6794_v46 = vpop.f32.mrf.mxu0 }
 0x22c   : > { %7093 = vst [vmem:[#allocation33_spill] sm:$0xff] %v6794_v46  ;;  %v3830_v46 = vadd.f32 %v5080_v62, %v3517_v25  ;;  %v3824_v62 = vadd.f32 %v6770_v48, %v3511_v41  ;;  %v3838_v48 = vadd.f32 %v6788_v17, %v3525_v8  ;;  %v3866_v17 = vadd.f32 %v6807_v21, %v7096_v61  ;;  %v7112_v8 = vld [vmem:[#allocation6_spill] sm:$0xff] }
 0x22d   : > { %v5092_v31 = vpop.f32.mrf.mxu0 }
 0x22e   : > { %v3873_v22 = vadd.f32 %v6807_v21, %v3830_v46  ;;  %v3842_v28 = vadd.f32 %v5092_v31, %v3529_v24  ;;  %v3826_v46 = vadd.f32 %v6766_v9, %v3513_v44  ;;  %v3526_v9 = vadd.f32 %v6772_v11, %v6679_v20 }
 0x22f   : > { %v3769_v4 = vpop.f32.mrf.mxu0  ;;  %v3868_v11 = vadd.f32 %v6807_v21, %v3825_v38 }
 0x230   : > { %v3840_v49 = vadd.f32 %v3769_v4, %v3527_v42  ;;  %v3839_v35 = vadd.f32 %v6792_v26, %v3526_v9  ;;  %v3867_v26 = vadd.f32 %v6807_v21, %v3824_v62  ;;  %v7110_v9 = vld [vmem:[#allocation7_spill] sm:$0xff] }
 0x231   : > { %v5093_v36 = vpop.f32.mrf.mxu0  ;;  %v3904_v15 = vmax.f32 %v3868_v11, 0.0 }
 0x232   : > { %v3843_v0 = vadd.f32 %v5093_v36, %v3530_v47  ;;  %v3909_v36 = vmax.f32 %v3873_v22, 0.0  ;;  %v3883_v32 = vadd.f32 %v6807_v21, %v3840_v49  ;;  %v7100_v22 = vld [vmem:[#allocation22_spill] sm:$0xff]  ;;  %v3903_v24 = vmax.f32 %v3867_v26, 0.0  ;;  %v7115_v26 = vld [vmem:[#allocation20_spill] sm:$0xff] }
 0x233   : > { %v3772_v34 = vpop.f32.mrf.mxu0  ;;  %v7095_v63 = vld [vmem:[#allocation33_spill] sm:$0xff]  ;;  %v3865_v56 = vadd.f32 %v6807_v21, %v7100_v22 }
 0x234   : > { %v3886_v14 = vadd.f32 %v6807_v21, %v3843_v0  ;;  %v3841_v30 = vadd.f32 %v3772_v34, %v3528_v40  ;;  %v3869_v34 = vadd.f32 %v6807_v21, %v3826_v46  ;;  %v3837_v47 = vadd.f32 %v7095_v63, %v3524_v57  ;;  %v7101_v0 = vld [vmem:[#allocation15_spill] sm:$0xff]  ;;  %v7119_v22 = vld [vmem:[#allocation13_spill] sm:$0xff] }
 0x235   : > { %v5096_v58 = vpop.f32.mrf.mxu0  ;;  %v7106_v46 = vld [vmem:[#allocation23_spill] sm:$0xff]  ;;  %v3901_v41 = vmax.f32 %v3865_v56, 0.0 }
 0x236   : > { %v3846_v55 = vadd.f32 %v5096_v58, %v3533_v50  ;;  %v3922_v29 = vmax.f32 %v3886_v14, 0.0  ;;  %v3884_v43 = vadd.f32 %v6807_v21, %v3841_v30  ;;  %v3905_v59 = vmax.f32 %v3869_v34, 0.0  ;;  %v7111_v34 = vld [vmem:[#allocation31_spill] sm:$0xff] }
 0x237   : > { %v3785_v51 = vpop.f32.mrf.mxu0  ;;  %v3880_v40 = vadd.f32 %v6807_v21, %v3837_v47 }
 0x238   : > { %v3889_v50 = vadd.f32 %v6807_v21, %v3846_v55  ;;  %v3844_v25 = vadd.f32 %v3785_v51, %v3531_v3  ;;  %v3827_v55 = vadd.f32 %v5077_v23, %v3514_v1  ;;  %v3910_v51 = vmax.f32 %v3874_v10, 0.0 }
 0x239   : > { %v5097_v5 = vpop.f32.mrf.mxu0  ;;  %v3523_v3 = vadd.f32 %v7094_v6, %v6672_v54  ;;  %v3920_v10 = vmax.f32 %v3884_v43, 0.0  ;;  %v3919_v54 = vmax.f32 %v3883_v32, 0.0 }
 0x23a   : > { %v3847_v19 = vadd.f32 %v5097_v5, %v3534_v39  ;;  %v3872_v39 = vadd.f32 %v6807_v21, %v3829_v37  ;;  %v3925_v13 = vmax.f32 %v3889_v50, 0.0  ;;  %v3887_v18 = vadd.f32 %v6807_v21, %v3844_v25  ;;  %v7097_v37 = vld [vmem:[#allocation17_spill] sm:$0xff] }
 0x23b   : > { %v3788_v53 = vpop.f32.mrf.mxu0  ;;  %v3870_v60 = vadd.f32 %v6807_v21, %v3827_v55  ;;  %v3885_v5 = vadd.f32 %v6807_v21, %v3842_v28  ;;  %v3881_v25 = vadd.f32 %v6807_v21, %v3838_v48  ;;  %v7103_v55 = vld [vmem:[#allocation30_spill] sm:$0xff]  ;;  %v3902_v28 = vmax.f32 %v3866_v17, 0.0  ;;  %v7117_v17 = vld [vmem:[#allocation11_spill] sm:$0xff] }
 0x23c   : > { %v3890_v58 = vadd.f32 %v6807_v21, %v3847_v19  ;;  %v3845_v45 = vadd.f32 %v3788_v53, %v3532_v27  ;;  %v3908_v12 = vmax.f32 %v3872_v39, 0.0  ;;  %v3923_v23 = vmax.f32 %v3887_v18, 0.0  ;;  %v5062_v27 = vpop.f32.mrf.mxu1  ;;  %v7098_v53 = vld [vmem:[#allocation8_spill] sm:$0xff] }
 0x23d   : > { %v3906_v20 = vmax.f32 %v3870_v60, 0.0  ;;  %v3921_v4 = vmax.f32 %v3885_v5, 0.0  ;;  %v3882_v19 = vadd.f32 %v6807_v21, %v3839_v35  ;;  %v3522_v50 = vadd.f32 %v7098_v53, %v7097_v37  ;;  %v5100_v1 = vpop.f32.mrf.mxu0  ;;  %v7108_v60 = vld [vmem:[#allocation24_spill] sm:$0xff] }
 0x23e   : > { %v3926_v2 = vmax.f32 %v3890_v58, 0.0  ;;  %v3888_v33 = vadd.f32 %v6807_v21, %v3845_v45  ;;  %v7099_v58 = vld [vmem:[#allocation32_spill] sm:$0xff]  ;;  %v3488_v44 = vpop.f32.mrf.mxu1  ;;  %v3917_v14 = vmax.f32 %v3881_v25, 0.0  ;;  %v3863_v38 = vadd.f32 %v6807_v21, %v7108_v60 }
 0x23f   : > { %v3836_v45 = vadd.f32 %v7099_v58, %v3523_v3  ;;  %v3918_v39 = vmax.f32 %v3882_v19, 0.0  ;;  %v3862_v35 = vadd.f32 %v6807_v21, %v7112_v8  ;;  %v4105_v60 = vld [vmem:[%s7021_s4 + $0x58] sm:$0xff]  ;;  %v4095_v8 = vld [vmem:[%s7021_s4 + $0x8] sm:$0xff] }
 0x240   : > { %4703 = vmatprep.subr.mxu1 %v3926_v2  ;;  %v3924_v31 = vmax.f32 %v3888_v33, 0.0  ;;  %v7102_v2 = vld [vmem:[#allocation5_spill] sm:$0xff]  ;;  %v5063_v49 = vpop.f32.mrf.mxu1 }
 0x241   : > { %4704 = vmatpush3.msra.mxu1 %v3910_v51  ;;  %v3521_v33 = vadd.f32 %v7102_v2, %v7101_v0  ;;  %v3835_v51 = vadd.f32 %v7103_v55, %v3522_v50  ;;  %v3879_v30 = vadd.f32 %v6807_v21, %v3836_v45  ;;  %v3538_v6 = vadd.f32 %v5063_v49, %v7115_v26  ;;  %v7118_v45 = vld [vmem:[#allocation19_spill] sm:$0xff] }
 0x242   : > { %4705 = vmatprep.subr.mxu1 %v3925_v13  ;;  %v7104_v13 = vld [vmem:[#allocation26_spill] sm:$0xff]  ;;  %v3491_v3 = vpop.f32.mrf.mxu1  ;;  %v3898_v47 = vmax.f32 %v3862_v35, 0.0  ;;  %v4094_v35 = vld [vmem:[%s7021_s4] sm:$0xff] }
 0x243   : > { %4706 = vmatpush3.msra.mxu1 %v3909_v36  ;;  %v3864_v18 = vadd.f32 %v6807_v21, %v7104_v13  ;;  %v3520_v36 = vadd.f32 %v7106_v46, %v7105_v52  ;;  %v3834_v42 = vadd.f32 %v7107_v7, %v3521_v33  ;;  %v3915_v57 = vmax.f32 %v3879_v30, 0.0  ;;  %v7120_v33 = vld [vmem:[#allocation12_spill] sm:$0xff]  ;;  %v4108_v30 = vld [vmem:[%s7021_s4 + $0x70] sm:$0xff] }
 0x244   : > { %4707 = vmatprep.subr.mxu1 %v3924_v31  ;;  %v3801_v31 = vpop.f32.mrf.mxu0  ;;  %v3536_v56 = vadd.f32 %v3491_v3, %v7119_v22  ;;  %v5347_v52 = vmov 0.0   ;;  %v4100_v49 = vld [vmem:[%s7021_s4 + $0x30] sm:$0xff] }
 0x245   : > { %4708 = vmatpush3.msra.mxu1 %v3908_v12  ;;  %v7109_v12 = vld [vmem:[#allocation16_spill] sm:$0xff]  ;;  %v3833_v62 = vadd.f32 %v7111_v34, %v3520_v36  ;;  %v3877_v43 = vadd.f32 %v6807_v21, %v3834_v42 }
 0x246   : > { %4709 = vmatprep.subr.mxu1 %v3923_v23  ;;  %v3519_v5 = vadd.f32 %v7110_v9, %v7109_v12  ;;  %v3878_v23 = vadd.f32 %v6807_v21, %v3835_v51  ;;  %v5101_v48 = vpop.f32.mrf.mxu0  ;;  %v4103_v12 = vld [vmem:[%s7021_s4 + $0x48] sm:$0xff]  ;;  %v4102_v9 = vld [vmem:[%s7021_s4 + $0x40] sm:$0xff] }
 0x247   : > { %4710 = vmatpush3.msra.mxu1 %v3907_v16  ;;  %v3916_v16 = vmax.f32 %v3880_v40, 0.0  ;;  %v3876_v63 = vadd.f32 %v6807_v21, %v3833_v62  ;;  %v3851_v37 = vadd.f32 %v5101_v48, %v3538_v6  ;;  %v3913_v53 = vmax.f32 %v3877_v43, 0.0  ;;  %v4098_v34 = vld [vmem:[%s7021_s4 + $0x20] sm:$0xff]  ;;  %v4097_v62 = vld [vmem:[%s7021_s4 + $0x18] sm:$0xff] }
 0x248   : > { %4711 = vmatprep.subr.mxu1 %v3922_v29  ;;  %v3900_v29 = vmax.f32 %v3864_v18, 0.0  ;;  %v3914_v19 = vmax.f32 %v3878_v23, 0.0  ;;  %v3804_v25 = vpop.f32.mrf.mxu0  ;;  %v4099_v23 = vld [vmem:[%s7021_s4 + $0x28] sm:$0xff] }
 0x249   : > { %4712 = vmatpush3.msra.mxu1 %v3906_v20  ;;  %v7113_v20 = vld [vmem:[#allocation29_spill] sm:$0xff]  ;;  %v3912_v0 = vmax.f32 %v3876_v63, 0.0  ;;  %v3894_v55 = vadd.f32 %v6807_v21, %v3851_v37  ;;  %v3849_v51 = vadd.f32 %v3804_v25, %v3536_v56 }
 0x24a   : > { %4713 = vmatprep.subr.mxu1 %v3921_v4  ;;  %v3832_v11 = vadd.f32 %v7113_v20, %v3519_v5  ;;  %v7114_v4 = vld [vmem:[#allocation14_spill] sm:$0xff]  ;;  %v4101_v5 = vld [vmem:[%s7021_s4 + $0x38] sm:$0xff] }
 0x24b   : > { %4714 = vmatpush3.msra.mxu1 %v3905_v59  ;;  %v3861_v32 = vadd.f32 %v6807_v21, %v7114_v4  ;;  %v3899_v59 = vmax.f32 %v3863_v38, 0.0  ;;  %v3930_v18 = vmax.f32 %v3894_v55, 0.0  ;;  %v4104_v38 = vld [vmem:[%s7021_s4 + $0x50] sm:$0xff] }
 0x24c   : > { %4715 = vmatprep.subr.mxu1 %v3920_v10  ;;  %v7116_v10 = vld [vmem:[#allocation21_spill] sm:$0xff]  ;;  %v3875_v50 = vadd.f32 %v6807_v21, %v3832_v11 }
 0x24d   : > { %4716 = vmatpush3.msra.mxu1 %v3904_v15  ;;  %v3860_v61 = vadd.f32 %v6807_v21, %v7116_v10  ;;  %v3537_v15 = vadd.f32 %v5062_v27, %v7117_v17  ;;  %v3897_v58 = vmax.f32 %v3861_v32, 0.0  ;;  %v3535_v27 = vadd.f32 %v3488_v44, %v7120_v33  ;;  %v7121_v44 = vld [vmem:[#allocation10_spill] sm:$0xff] }
 0x24e   : > { %4717 = vmatprep.subr.mxu1 %v3919_v54  ;;  %v3859_v54 = vadd.f32 %v6807_v21, %v7118_v45 }
 0x24f   : > { %4718 = vmatpush3.msra.mxu1 %v3903_v24  ;;  %v3850_v24 = vadd.f32 %v5100_v1, %v3537_v15  ;;  %v3896_v2 = vmax.f32 %v3860_v61, 0.0  ;;  %v3848_v13 = vadd.f32 %v3801_v31, %v3535_v27  ;;  %v3892_v1 = vadd.f32 %v6807_v21, %v3849_v51  ;;  %v4107_v31 = vld [vmem:[%s7021_s4 + $0x68] sm:$0xff] }
 0x250   : > { %4719 = vmatprep.subr.mxu1 %v3918_v39  ;;  %v3911_v39 = vmax.f32 %v3875_v50, 0.0  ;;  %v3895_v40 = vmax.f32 %v3859_v54, 0.0 }
 0x251   : > { %4720 = vmatpush3.msra.mxu1 %v3902_v28  ;;  %v3893_v28 = vadd.f32 %v6807_v21, %v3850_v24  ;;  %v3891_v36 = vadd.f32 %v6807_v21, %v3848_v13  ;;  %v3928_v7 = vmax.f32 %v3892_v1, 0.0  ;;  %v4109_v21 = vld [vmem:[%s7021_s4 + $0x78] sm:$0xff] }
 0x252   : > { %4721 = vmatprep.subr.mxu1 %v3917_v14  ;;  %v7122_v14 = vld [vmem:[#allocation18_spill] sm:$0xff] }
 0x253   : > { %4722 = vmatpush3.msra.mxu1 %v3901_v41  ;;  %v3929_v46 = vmax.f32 %v3893_v28, 0.0  ;;  %v3927_v42 = vmax.f32 %v3891_v36, 0.0  ;;  %v4106_v41 = vld [vmem:[%s7021_s4 + $0x60] sm:$0xff] }
 0x254   : > { %4723 = vmatprep.subr.mxu1 %v3916_v16  ;;  %v4096_v16 = vld [vmem:[%s7021_s4 + $0x10] sm:$0xff] }
 0x255   : > { %4724 = vmatpush3.msra.mxu1 %v3900_v29 }
 0x256   : > { %4725 = vmatprep.subr.mxu1 %v3915_v57 }
 0x257   : > { %4726 = vmatpush3.msra.mxu1 %v3899_v59 }
 0x258   : > { %4727 = vmatprep.subr.mxu1 %v3914_v19 }
 0x259   : > { %4728 = vmatpush3.msra.mxu1 %v3898_v47 }
 0x25a   : > { %4729 = vmatprep.subr.mxu1 %v3913_v53 }
 0x25b   : > { %4730 = vmatpush3.msra.mxu1 %v3897_v58 }
 0x25c   : > { %4731 = vmatprep.subr.mxu1 %v3912_v0 }
 0x25d   : > { %4732 = vmatpush3.msra.mxu1 %v3896_v2 }
 0x25e   : > { %4733 = vmatprep.subr.mxu1 %v3911_v39 }
 0x25f   : > { %4734 = vmatpush3.msra.mxu1 %v3895_v40 }
 0x260   : > { %5102 = vmatprep.subr.mxu1 %v5347_v52  ;;  %4019 = vmatmul.mubr.f32.vlgmr.msra.gmra.mxu1 %v7121_v44 }
 0x261   : > { %5103 = vmatpush3.msk.msra.mxu1 %vm2339_vm5, %v3930_v18  ;;  %5110 = vmatprep.mubr.msk.f32.mxu1 %vm5348_vm8, %v5347_v52 }
 0x262   : > { %5104 = vmatprep.subr.mxu1 %v5347_v52 }
 0x263   : > { %5105 = vmatpush3.msra.mxu1 %v3929_v46 }
 0x264   : > { %5106 = vmatprep.subr.mxu1 %v5347_v52 }
 0x265   : > { %5107 = vmatpush3.msra.mxu1 %v3928_v7 }
 0x266   : > { %5108 = vmatprep.subr.mxu1 %v5347_v52 }
 0x267   : > { %5109 = vmatpush3.msra.mxu1 %v3927_v42 }
 0x268   : > { %5111 = vmatmul.mubr.msk.f32.vlgmr.msra.gmra.mxu1 %vm3947_vm9, %v7122_v14  ;;  %5113 = vmatprep.subr.mxu1 %v5347_v52 }
 0x269   : > { %5114 = vmatpush3.msra.mxu1 %v4109_v21  ;;  %5145 = vmatprep.mubr.msk.f32.mxu1 %vm5348_vm8, %v5347_v52 }
 0x26a   : > { %5115 = vmatprep.subr.mxu1 %v5347_v52 }
 0x26b   : > { %5116 = vmatpush3.msra.mxu1 %v4108_v30 }
 0x26c   : > { %5117 = vmatprep.subr.mxu1 %v5347_v52 }
 0x26d   : > { %5118 = vmatpush3.msra.mxu1 %v4107_v31 }
 0x26e   : > { %5119 = vmatprep.subr.mxu1 %v5347_v52 }
 0x26f   : > { %5120 = vmatpush3.msra.mxu1 %v4106_v41 }
 0x270   : > { %5121 = vmatprep.subr.mxu1 %v5347_v52 }
 0x271   : > { %5122 = vmatpush3.msra.mxu1 %v4105_v60 }
 0x272   : > { %5123 = vmatprep.subr.mxu1 %v5347_v52 }
 0x273   : > { %5124 = vmatpush3.msra.mxu1 %v4104_v38 }
 0x274   : > { %5125 = vmatprep.subr.mxu1 %v5347_v52 }
 0x275   : > { %5126 = vmatpush3.msra.mxu1 %v4103_v12 }
 0x276   : > { %5127 = vmatprep.subr.mxu1 %v5347_v52 }
 0x277   : > { %5128 = vmatpush3.msra.mxu1 %v4102_v9 }
 0x278   : > { %5129 = vmatprep.subr.mxu1 %v5347_v52 }
 0x279   : > { %5130 = vmatpush3.msra.mxu1 %v4101_v5 }
 0x27a   : > { %5131 = vmatprep.subr.mxu1 %v5347_v52 }
 0x27b   : > { %5132 = vmatpush3.msra.mxu1 %v4100_v49 }
 0x27c   : > { %5133 = vmatprep.subr.mxu1 %v5347_v52 }
 0x27d   : > { %5134 = vmatpush3.msra.mxu1 %v4099_v23 }
 0x27e   : > { %5135 = vmatprep.subr.mxu1 %v5347_v52 }
 0x27f   : > { %5136 = vmatpush3.msra.mxu1 %v4098_v34 }
 0x280   : > { %5137 = vmatprep.subr.mxu1 %v5347_v52 }
 0x281   : > { %5138 = vmatpush3.msra.mxu1 %v4097_v62 }
 0x282   : > { %5139 = vmatprep.subr.mxu1 %v5347_v52 }
 0x283   : > { %5140 = vmatpush3.msra.mxu1 %v4096_v16 }
 0x284   : > { %5141 = vmatprep.subr.mxu1 %v5347_v52 }
 0x285   : > { %5142 = vmatpush3.msra.mxu1 %v4095_v8 }
 0x286   : > { %5143 = vmatprep.subr.mxu1 %v5347_v52 }
 0x287   : > { %5144 = vmatpush3.msra.mxu1 %v4094_v35 }
 0x320   : > { %v4735_v29 = vpop.f32.mrf.mxu1 }
 0x322   : > { %v4736_v43 = vpop.f32.mrf.mxu1 }
 0x323   : > { %v4737_v20 = vadd.f32 %v4736_v43, %v4735_v29 }
 0x328   : > { %v4090_v11 = vpop.f32.mrf.mxu1 }
 0x329   : > { %v4091_v57 = vadd.f32 %v4737_v20, %v4090_v11 }
 0x32a   : > { %v5112_v48 = vpop.f32.mrf.mxu1 }
 0x32b   : > { %4182 = vst [vmem:[%s276_s21] sm:$0x1] %v4091_v57  ;;  %5146 = vmatmul.mubr.f32.vlgmr.msra.gmra.mxu1 %v4091_v57 }
 0x32c   : > { %5298 = shalt.err (!%p5295_p3)
}
 0x32d   : > { %s5299_s28 = scalar_lea.hbm %s4200_s8, 16  ;;  %s5303_s21 = scalar_lea.hbm %s7024_s7, 32 }
 0x32e   : > { %p5300_p4 = scmp.ne.s32.totalorder %s4200_s8, %s5299_s28  ;;  %p5304_p9 = scmp.lt.s32.totalorder %s4200_s8, %s7024_s7 }
 0x32f   : > { %p5305_p10 = scmp.lt.s32.totalorder %s5303_s21, %s5299_s28 }
 0x330   : > { %p5301_p7 = pnand %p5300_p4, %p5428_p5 }
 0x331   : > { %p5306_p11 = por %p5305_p10, %p5304_p9 }
 0x332   : > { %p5302_p8 = pneg %p5301_p7 }
 0x334   : > { %p5307_p12 = pnand %p5306_p11, %p5302_p8 }
 0x336   : > { %5310 = shalt.err (!%p5307_p12)
}
 0x337   : > { %5161 = dma.vmem_to_hbm [thread:$0]  (%p5428_p5), %s4203_s9, 16, %s4200_s8, %s4187_s13   ;;  %v4110_v4 = vld [vmem:[%s7022_s5] sm:$0x1] }
 0x338   : > { %s284_s18 = scalar_lea.vmem %s7023_s6, %s5446_s17 }
 0x3eb   : > { %v4177_v32 = vpop.f32.mrf.mxu1 }
 0x3ec   : > { %v4178_v59 = vadd.f32 %v4177_v32, %v4110_v4 }
 0x3ed   : > { %v5147_v26 = vpop.f32.mrf.mxu1 }
 0x3ee   : > { %4181 = vst [vmem:[%s284_s18] sm:$0x1] %v4178_v59 }
 0x3ef PF: > { %p5167_p13 = scmp.ge.s32.totalorder %s5345_s27, 2  ;;  %s4220_s11 = sand.u32 1, %s5333_s24  }
 0x3f0   : > { %s4221_s8 = scalar_lea.sflag [#allocation3], %s4220_s11 }
 0x3f1   : > { %p5164_p5 = pnand %p5167_p13, %p5432_p6 }
 0x3f3   : > { %p5165_p0 = pneg %p5164_p5 }
 0x3f5   : > { %5328 = dma.done.wait (%p5165_p0), %s4221_s8, 16  }
 0x3f6   : > { %5330 = vsyncadd (%p5165_p0), %s4221_s8, 4294967280  ;;  %p18_p1 = scmp.ge.s32.totalorder %s5415_s30, 4   ;;  %s7123_s24 = smov %s5337_s25 }
 0x3f7   : > { %s7124_s25 = smov %s5341_s26  ;;  %s7125_s26 = smov %s5426_s10 }
 0x3f8   : > { %s7126_s27 = smov %s5415_s30  ;;  %20 = sbr.rel (!%p18_p1) target bundleno = 3 (0x3), region = 91 }
 0x3fd   :  { %4225 = vsyncpa [#allocation3], 1 }
 0x3fe   :  { %4227 = vsyncpa [#allocation3 + $0x1], 1 }

</bundles_post_ra>
